<compile_context>
chip_gen: v7x
topology: tpu7x:2x2x1
jax: 0.10.0
libtpu: 0.0.40
codegen_flags: <defaults>
</compile_context>

<pallas_src>
import functools
import math

import jax
import jax.numpy as jnp
from jax.experimental import pallas as pl
from jax.experimental.pallas import tpu as pltpu


def _round_up(x, m):
    return (x + m - 1) // m * m


def _choose_row_band(ho, wo, max_rows=4096):
    """Largest divisor rb of ho with rb*wo <= max_rows and (rb*wo) % 16 == 0."""
    if ho * wo <= max_rows:
        return ho
    best = None
    for rb in range(1, ho + 1):
        if ho % rb == 0 and rb * wo <= max_rows and (rb * wo) % 16 == 0:
            best = rb
    return best if best is not None else ho


# ---------------------------------------------------------------------------
# Fused conv kernel: for one (image, output-row-band) grid step, accumulate
# the kh*kw shifted sub-matmuls in VMEM (f32), add bias, optional ReLU, store.
# Input is the phase-split padded activation: phase (p, q) holds
# x_pad[s*h + p, s*w + q], so every tap slice below is unit-stride.
# ---------------------------------------------------------------------------
def _fused_conv_kernel(x_ref, w_ref, b_ref, o_ref, *, kh, kw, stride, rb, wo,
                       apply_relu):
    cin = x_ref.shape[-1]
    cout = o_ref.shape[-1]
    row0 = pl.program_id(1) * rb                     # first output row of band
    acc = jnp.zeros((rb * wo, cout), jnp.float32)
    for i in range(kh):                              # static, unrolled taps
        a, p = i // stride, i % stride
        for j in range(kw):
            b, q = j // stride, j % stride
            tap = x_ref[p * stride + q, pl.ds(row0 + a, rb), pl.ds(b, wo), :]
            tap = tap.reshape(rb * wo, cin)
            acc += jnp.dot(tap, w_ref[i * kw + j],
                           preferred_element_type=jnp.float32)
    acc += b_ref[...]                                # (1, cout) broadcast
    if apply_relu:
        acc = jnp.maximum(acc, 0.0)
    o_ref[0] = acc.astype(o_ref.dtype)


def conv2d_pallas_fused(x_nhwc, w_hwio, bias, *, stride, padding, apply_relu,
                        out_dtype):
    """Conv2d via the fused Pallas kernel. Returns (n, ho, wo, cout_padded)."""
    n, h, w, cin = x_nhwc.shape
    kh, kw, wcin, cout = w_hwio.shape
    assert wcin == cin, (wcin, cin)
    s = stride
    ho = (h + 2 * padding - kh) // s + 1
    wo = (w + 2 * padding - kw) // s + 1

    # Zero-pad spatially; round padded dims to a multiple of the stride so the
    # phase split is a plain reshape (+ one 1x transpose pass when s > 1).
    hp = _round_up(h + 2 * padding, s)
    wp = _round_up(w + 2 * padding, s)
    xq = x_nhwc.astype(jnp.bfloat16)
    xp = jnp.pad(xq, ((0, 0),
                      (padding, hp - h - padding),
                      (padding, wp - w - padding),
                      (0, 0)))
    hh, wh = hp // s, wp // s
    if s == 1:
        x_ph = xp                                            # single phase
    else:
        x_ph = (xp.reshape(n, hh, s, wh, s, cin)
                  .transpose(0, 2, 4, 1, 3, 5)               # (n, s, s, hh, wh, c)
                  .reshape(n * s * s, hh, wh, cin))

    # Lane-dense outputs: pad cout to a multiple of 128 (zeros); the caller
    # folds the channel slice into its next relayout/consumer.
    cout_p = _round_up(cout, 128)
    w_t = w_hwio.reshape(kh * kw, cin, cout).astype(jnp.bfloat16)
    b2d = bias.astype(jnp.float32).reshape(1, cout)
    if cout_p != cout:
        w_t = jnp.pad(w_t, ((0, 0), (0, 0), (0, cout_p - cout)))
        b2d = jnp.pad(b2d, ((0, 0), (0, cout_p - cout)))

    rb = _choose_row_band(ho, wo)
    grid = (n, ho // rb)

    kernel = functools.partial(_fused_conv_kernel, kh=kh, kw=kw, stride=s,
                               rb=rb, wo=wo, apply_relu=apply_relu)
    out_bytes = n * ho * wo * cout_p * jnp.dtype(out_dtype).itemsize
    cost = pl.CostEstimate(
        flops=2 * n * ho * wo * kh * kw * cin * cout_p,
        transcendentals=0,
        bytes_accessed=x_ph.size * 2 + w_t.size * 2 + b2d.size * 4 + out_bytes)

    out = pl.pallas_call(
        kernel,
        out_shape=jax.ShapeDtypeStruct((n, ho * wo, cout_p), out_dtype),
        grid=grid,
        in_specs=[
            # Whole phase-split image per batch element; index constant in the
            # band axis so it is DMA'd once per image and stays resident.
            pl.BlockSpec((s * s, hh, wh, cin), lambda i, j: (i, 0, 0, 0)),
            pl.BlockSpec((kh * kw, cin, cout_p), lambda i, j: (0, 0, 0)),
            pl.BlockSpec((1, cout_p), lambda i, j: (0, 0)),
        ],
        out_specs=pl.BlockSpec((1, rb * wo, cout_p), lambda i, j: (i, j, 0)),
        compiler_params=pltpu.CompilerParams(
            dimension_semantics=("parallel", "parallel"),
            vmem_limit_bytes=32 * 1024 * 1024),
        cost_estimate=cost,
    )(x_ph, w_t, b2d)
    return out.reshape(n, ho, wo, cout_p)


# ---------------------------------------------------------------------------
# Cheap im2col for conv1 only (cin=3 -> K=48; negligible blowup).  Feature
# order is (kh, kw, cin), matching w.reshape(1, 1, kh*kw*cin, cout).
# ---------------------------------------------------------------------------
def _im2col(x_nhwc, kh, kw, stride, padding):
    n, h, w, c = x_nhwc.shape
    ho = (h + 2 * padding - kh) // stride + 1
    wo = (w + 2 * padding - kw) // stride + 1
    xp = jnp.pad(x_nhwc, ((0, 0), (padding, padding), (padding, padding), (0, 0)))
    cols = []
    for i in range(kh):
        for j in range(kw):
            cols.append(xp[:, i:i + ho * stride:stride,
                           j:j + wo * stride:stride, :])
    return jnp.concatenate(cols, axis=-1)            # (n, ho, wo, kh*kw*c)


# ---------------------------------------------------------------------------
# Parameter init (PyTorch Conv2d default: U(-1/sqrt(fan_in), 1/sqrt(fan_in)))
# ---------------------------------------------------------------------------
def init_encoder_params(key, latent_dim=128, dtype=jnp.float32):
    def conv_init(kw_key, kb_key, kh, kw, cin, cout):
        fan_in = cin * kh * kw
        bound = 1.0 / math.sqrt(fan_in)
        w = jax.random.uniform(kw_key, (kh, kw, cin, cout), dtype, -bound, bound)
        b = jax.random.uniform(kb_key, (cout,), dtype, -bound, bound)
        return w, b

    keys = jax.random.split(key, 6)
    w1, b1 = conv_init(keys[0], keys[1], 4, 4, 3, 64)
    w2, b2 = conv_init(keys[2], keys[3], 4, 4, 64, 128)
    w3, b3 = conv_init(keys[4], keys[5], 3, 3, 128, latent_dim)
    return (w1, b1, w2, b2, w3, b3)


# ---------------------------------------------------------------------------
# Encoder forward (NCHW in / NCHW out, matching the PyTorch module)
# ---------------------------------------------------------------------------
@jax.jit
def encoder_forward(x_nchw, params):
    cw1, cb1, cw2, cb2, cw3, cb3 = params
    latent = cw3.shape[-1]
    x = jnp.transpose(x_nchw, (0, 2, 3, 1)).astype(jnp.bfloat16)   # NHWC bf16

    # conv1: cin=3 is too lane-sparse for the fused path, so im2col (K=48) and
    # run it as a 1x1 fused conv.  bf16 output, cout padded 64->128.
    p1 = _im2col(x, 4, 4, 2, 1)                                    # (n,h1,w1,48)
    y1 = conv2d_pallas_fused(p1, cw1.reshape(1, 1, -1, cw1.shape[-1]), cb1,
                             stride=1, padding=0, apply_relu=True,
                             out_dtype=jnp.bfloat16)               # (n,h1,w1,128)
    # conv2: fused (no HBM im2col).  Channel slice of conv1's padded output is
    # folded into conv2's pad + phase-split relayout.
    y2 = conv2d_pallas_fused(y1[..., :cw2.shape[2]], cw2, cb2,
                             stride=2, padding=1, apply_relu=True,
                             out_dtype=jnp.bfloat16)               # (n,h2,w2,128)
    # conv3: fused, final layer in f32.
    y3 = conv2d_pallas_fused(y2[..., :cw3.shape[2]], cw3, cb3,
                             stride=1, padding=1, apply_relu=False,
                             out_dtype=jnp.float32)                # (n,h2,w2,latp)
    return jnp.transpose(y3[..., :latent], (0, 3, 1, 2))           # NCHW


# ---------------------------------------------------------------------------
# Pure-JAX reference (lax.conv with the same bf16 input/intermediate quant)
# ---------------------------------------------------------------------------
def _ref_conv(x_nhwc, w_hwio, b, stride, padding, relu):
    y = jax.lax.conv_general_dilated(
        x_nhwc.astype(jnp.bfloat16), w_hwio.astype(jnp.bfloat16),
        window_strides=(stride, stride),
        padding=[(padding, padding), (padding, padding)],
        dimension_numbers=("NHWC", "HWIO", "NHWC"),
        preferred_element_type=jnp.float32,
    ) + b.astype(jnp.float32)
    return jnp.maximum(y, 0.0) if relu else y


def _ref_forward(x_nchw, params):
    w1, b1, w2, b2, w3, b3 = params
    x = jnp.transpose(x_nchw, (0, 2, 3, 1))
    x = _ref_conv(x, w1, b1, 2, 1, True)
    x = _ref_conv(x, w2, b2, 2, 1, True)
    x = _ref_conv(x, w3, b3, 1, 1, False)
    return jnp.transpose(x, (0, 3, 1, 2))


if __name__ == "__main__":
    latent_dim = 128
    key = jax.random.PRNGKey(0)
    k_x, k_p = jax.random.split(key)

    # Small NCHW input: batch=2, channels=3, spatial=16x16 -> output (2,128,4,4)
    x = jax.random.normal(k_x, (2, 3, 16, 16), dtype=jnp.float32)
    params = init_encoder_params(k_p, latent_dim=latent_dim)

    out = jax.block_until_ready(encoder_forward(x, params))
    assert out.shape == (2, latent_dim, 4, 4), out.shape

    ref = jax.block_until_ready(_ref_forward(x, params))
    max_err = float(jnp.max(jnp.abs(out - ref)))
    assert jnp.allclose(out, ref, atol=1e-2, rtol=1e-2), max_err

    print("KERNEL_OK")
</pallas_src>

<mosaic_0001>
module attributes {stable_mosaic.version = 11 : i64} {
  func.func @_fused_conv_kernel(%arg0: i32, %arg1: i32, %arg2: memref<1x8x8x48xbf16, #tpu.memory_space<vmem>>, %arg3: memref<1x48x128xbf16, #tpu.memory_space<vmem>>, %arg4: memref<1x128xf32, #tpu.memory_space<vmem>>, %arg5: memref<1x64x128xbf16, #tpu.memory_space<vmem>>) attributes {dimension_semantics = [#tpu.dimension_semantics<parallel>, #tpu.dimension_semantics<parallel>], iteration_bounds = array<i64: 2, 1>, scalar_prefetch = 0 : i64, scratch_operands = 0 : i64, tpu.core_type = #tpu.core_type<tc>, window_params = [{transform_indices = @transform_0, window_bounds = array<i64: 1, 8, 8, 48>}, {pipeline_mode = #tpu.pipeline_mode<synchronous>, transform_indices = @transform_1, window_bounds = array<i64: 1, 48, 128>}, {pipeline_mode = #tpu.pipeline_mode<synchronous>, transform_indices = @transform_2, window_bounds = array<i64: 1, 128>}, {transform_indices = @transform_3, window_bounds = array<i64: 1, 64, 128>}]} {
    %c8_i32 = arith.constant 8 : i32
    %0 = arith.muli %arg1, %c8_i32 : i32
    %cst = arith.constant 0.000000e+00 : f32
    %1 = vector.broadcast %cst : f32 to vector<64x128xf32>
    %c0_i32 = arith.constant 0 : i32
    %2 = arith.addi %0, %c0_i32 : i32
    %c0 = arith.constant 0 : index
    %3 = arith.index_cast %2 : i32 to index
    %c0_0 = arith.constant 0 : index
    %c0_1 = arith.constant 0 : index
    %4 = vector.load %arg2[%c0, %3, %c0_0, %c0_1] : memref<1x8x8x48xbf16, #tpu.memory_space<vmem>>, vector<1x8x8x48xbf16>
    %5 = vector.shape_cast %4 : vector<1x8x8x48xbf16> to vector<8x8x48xbf16>
    %6 = vector.shape_cast %5 : vector<8x8x48xbf16> to vector<64x48xbf16>
    %c0_2 = arith.constant 0 : index
    %c0_3 = arith.constant 0 : index
    %c0_4 = arith.constant 0 : index
    %7 = vector.load %arg3[%c0_2, %c0_3, %c0_4] : memref<1x48x128xbf16, #tpu.memory_space<vmem>>, vector<1x48x128xbf16>
    %8 = vector.shape_cast %7 : vector<1x48x128xbf16> to vector<48x128xbf16>
    %cst_5 = arith.constant dense<0.000000e+00> : vector<64x128xf32>
    %9 = tpu.matmul %6, %8, %cst_5 {dimension_numbers = #tpu.dot_dimension_numbers<[1], [0], [0], [1], [0, 0, 1, 1], [], []>} : vector<64x48xbf16>, vector<48x128xbf16>, vector<64x128xf32> -> vector<64x128xf32>
    %10 = arith.addf %1, %9 : vector<64x128xf32>
    %c0_6 = arith.constant 0 : index
    %c0_7 = arith.constant 0 : index
    %11 = vector.load %arg4[%c0_6, %c0_7] : memref<1x128xf32, #tpu.memory_space<vmem>>, vector<1x128xf32>
    %12 = vector.broadcast %11 : vector<1x128xf32> to vector<64x128xf32>
    %13 = arith.addf %10, %12 : vector<64x128xf32>
    %cst_8 = arith.constant 0.000000e+00 : f32
    %14 = vector.broadcast %cst_8 : f32 to vector<64x128xf32>
    %15 = arith.maximumf %13, %14 : vector<64x128xf32>
    %16 = arith.truncf %15 : vector<64x128xf32> to vector<64x128xbf16>
    %c0_9 = arith.constant 0 : index
    %c0_10 = arith.constant 0 : index
    %c0_11 = arith.constant 0 : index
    %17 = vector.load %arg5[%c0_9, %c0_10, %c0_11] : memref<1x64x128xbf16, #tpu.memory_space<vmem>>, vector<1x64x128xbf16>
    %18 = vector.shape_cast %17 : vector<1x64x128xbf16> to vector<64x128xbf16>
    %19 = vector.shape_cast %16 : vector<64x128xbf16> to vector<1x64x128xbf16>
    tpu.vector_store %arg5[%c0_9, %c0_10, %c0_11], %19 {strides = array<i32>} : memref<1x64x128xbf16, #tpu.memory_space<vmem>>, vector<1x64x128xbf16>,
    return
  }
  func.func @transform_0(%arg0: i32, %arg1: i32) -> (i32, i32, i32, i32) {
    %c0_i32 = arith.constant 0 : i32
    %c0_i32_0 = arith.constant 0 : i32
    %c0_i32_1 = arith.constant 0 : i32
    %c0_i32_2 = arith.constant 0 : i32
    return %arg0, %c0_i32, %c0_i32_0, %c0_i32_1 : i32, i32, i32, i32
  }
  func.func @transform_1(%arg0: i32, %arg1: i32) -> (i32, i32, i32) {
    %c0_i32 = arith.constant 0 : i32
    %c0_i32_0 = arith.constant 0 : i32
    %c0_i32_1 = arith.constant 0 : i32
    %c0_i32_2 = arith.constant 0 : i32
    return %c0_i32, %c0_i32_0, %c0_i32_1 : i32, i32, i32
  }
  func.func @transform_2(%arg0: i32, %arg1: i32) -> (i32, i32) {
    %c0_i32 = arith.constant 0 : i32
    %c0_i32_0 = arith.constant 0 : i32
    %c0_i32_1 = arith.constant 0 : i32
    return %c0_i32, %c0_i32_0 : i32, i32
  }
  func.func @transform_3(%arg0: i32, %arg1: i32) -> (i32, i32, i32) {
    %c0_i32 = arith.constant 0 : i32
    %c0_i32_0 = arith.constant 0 : i32
    return %arg0, %arg1, %c0_i32 : i32, i32, i32
  }
}

module attributes {stable_mosaic.version = 11 : i64} {
  func.func @_fused_conv_kernel(%arg0: i32, %arg1: i32, %arg2: memref<4x5x5x64xbf16, #tpu.memory_space<vmem>>, %arg3: memref<16x64x128xbf16, #tpu.memory_space<vmem>>, %arg4: memref<1x128xf32, #tpu.memory_space<vmem>>, %arg5: memref<1x16x128xbf16, #tpu.memory_space<vmem>>) attributes {dimension_semantics = [#tpu.dimension_semantics<parallel>, #tpu.dimension_semantics<parallel>], iteration_bounds = array<i64: 2, 1>, scalar_prefetch = 0 : i64, scratch_operands = 0 : i64, tpu.core_type = #tpu.core_type<tc>, window_params = [{transform_indices = @transform_0, window_bounds = array<i64: 4, 5, 5, 64>}, {pipeline_mode = #tpu.pipeline_mode<synchronous>, transform_indices = @transform_1, window_bounds = array<i64: 16, 64, 128>}, {pipeline_mode = #tpu.pipeline_mode<synchronous>, transform_indices = @transform_2, window_bounds = array<i64: 1, 128>}, {transform_indices = @transform_3, window_bounds = array<i64: 1, 16, 128>}]} {
    %c4_i32 = arith.constant 4 : i32
    %0 = arith.muli %arg1, %c4_i32 : i32
    %cst = arith.constant 0.000000e+00 : f32
    %1 = vector.broadcast %cst : f32 to vector<16x128xf32>
    %c0_i32 = arith.constant 0 : i32
    %2 = arith.addi %0, %c0_i32 : i32
    %c0 = arith.constant 0 : index
    %3 = arith.index_cast %2 : i32 to index
    %c0_0 = arith.constant 0 : index
    %c0_1 = arith.constant 0 : index
    %4 = vector.load %arg2[%c0, %3, %c0_0, %c0_1] : memref<4x5x5x64xbf16, #tpu.memory_space<vmem>>, vector<1x4x4x64xbf16>
    %5 = vector.shape_cast %4 : vector<1x4x4x64xbf16> to vector<4x4x64xbf16>
    %6 = vector.shape_cast %5 : vector<4x4x64xbf16> to vector<16x64xbf16>
    %c0_2 = arith.constant 0 : index
    %c0_3 = arith.constant 0 : index
    %c0_4 = arith.constant 0 : index
    %7 = vector.load %arg3[%c0_2, %c0_3, %c0_4] : memref<16x64x128xbf16, #tpu.memory_space<vmem>>, vector<1x64x128xbf16>
    %8 = vector.shape_cast %7 : vector<1x64x128xbf16> to vector<64x128xbf16>
    %cst_5 = arith.constant dense<0.000000e+00> : vector<16x128xf32>
    %9 = tpu.matmul %6, %8, %cst_5 {dimension_numbers = #tpu.dot_dimension_numbers<[1], [0], [0], [1], [0, 0, 1, 1], [], []>} : vector<16x64xbf16>, vector<64x128xbf16>, vector<16x128xf32> -> vector<16x128xf32>
    %10 = arith.addf %1, %9 : vector<16x128xf32>
    %c0_i32_6 = arith.constant 0 : i32
    %11 = arith.addi %0, %c0_i32_6 : i32
    %c1 = arith.constant 1 : index
    %12 = arith.index_cast %11 : i32 to index
    %c0_7 = arith.constant 0 : index
    %c0_8 = arith.constant 0 : index
    %13 = vector.load %arg2[%c1, %12, %c0_7, %c0_8] : memref<4x5x5x64xbf16, #tpu.memory_space<vmem>>, vector<1x4x4x64xbf16>
    %14 = vector.shape_cast %13 : vector<1x4x4x64xbf16> to vector<4x4x64xbf16>
    %15 = vector.shape_cast %14 : vector<4x4x64xbf16> to vector<16x64xbf16>
    %c1_9 = arith.constant 1 : index
    %c0_10 = arith.constant 0 : index
    %c0_11 = arith.constant 0 : index
    %16 = vector.load %arg3[%c1_9, %c0_10, %c0_11] : memref<16x64x128xbf16, #tpu.memory_space<vmem>>, vector<1x64x128xbf16>
    %17 = vector.shape_cast %16 : vector<1x64x128xbf16> to vector<64x128xbf16>
    %cst_12 = arith.constant dense<0.000000e+00> : vector<16x128xf32>
    %18 = tpu.matmul %15, %17, %cst_12 {dimension_numbers = #tpu.dot_dimension_numbers<[1], [0], [0], [1], [0, 0, 1, 1], [], []>} : vector<16x64xbf16>, vector<64x128xbf16>, vector<16x128xf32> -> vector<16x128xf32>
    %19 = arith.addf %10, %18 : vector<16x128xf32>
    %c0_i32_13 = arith.constant 0 : i32
    %20 = arith.addi %0, %c0_i32_13 : i32
    %c0_14 = arith.constant 0 : index
    %21 = arith.index_cast %20 : i32 to index
    %c1_15 = arith.constant 1 : index
    %c0_16 = arith.constant 0 : index
    %22 = vector.load %arg2[%c0_14, %21, %c1_15, %c0_16] : memref<4x5x5x64xbf16, #tpu.memory_space<vmem>>, vector<1x4x4x64xbf16>
    %23 = vector.shape_cast %22 : vector<1x4x4x64xbf16> to vector<4x4x64xbf16>
    %24 = vector.shape_cast %23 : vector<4x4x64xbf16> to vector<16x64xbf16>
    %c2 = arith.constant 2 : index
    %c0_17 = arith.constant 0 : index
    %c0_18 = arith.constant 0 : index
    %25 = vector.load %arg3[%c2, %c0_17, %c0_18] : memref<16x64x128xbf16, #tpu.memory_space<vmem>>, vector<1x64x128xbf16>
    %26 = vector.shape_cast %25 : vector<1x64x128xbf16> to vector<64x128xbf16>
    %cst_19 = arith.constant dense<0.000000e+00> : vector<16x128xf32>
    %27 = tpu.matmul %24, %26, %cst_19 {dimension_numbers = #tpu.dot_dimension_numbers<[1], [0], [0], [1], [0, 0, 1, 1], [], []>} : vector<16x64xbf16>, vector<64x128xbf16>, vector<16x128xf32> -> vector<16x128xf32>
    %28 = arith.addf %19, %27 : vector<16x128xf32>
    %c0_i32_20 = arith.constant 0 : i32
    %29 = arith.addi %0, %c0_i32_20 : i32
    %c1_21 = arith.constant 1 : index
    %30 = arith.index_cast %29 : i32 to index
    %c1_22 = arith.constant 1 : index
    %c0_23 = arith.constant 0 : index
    %31 = vector.load %arg2[%c1_21, %30, %c1_22, %c0_23] : memref<4x5x5x64xbf16, #tpu.memory_space<vmem>>, vector<1x4x4x64xbf16>
    %32 = vector.shape_cast %31 : vector<1x4x4x64xbf16> to vector<4x4x64xbf16>
    %33 = vector.shape_cast %32 : vector<4x4x64xbf16> to vector<16x64xbf16>
    %c3 = arith.constant 3 : index
    %c0_24 = arith.constant 0 : index
    %c0_25 = arith.constant 0 : index
    %34 = vector.load %arg3[%c3, %c0_24, %c0_25] : memref<16x64x128xbf16, #tpu.memory_space<vmem>>, vector<1x64x128xbf16>
    %35 = vector.shape_cast %34 : vector<1x64x128xbf16> to vector<64x128xbf16>
    %cst_26 = arith.constant dense<0.000000e+00> : vector<16x128xf32>
    %36 = tpu.matmul %33, %35, %cst_26 {dimension_numbers = #tpu.dot_dimension_numbers<[1], [0], [0], [1], [0, 0, 1, 1], [], []>} : vector<16x64xbf16>, vector<64x128xbf16>, vector<16x128xf32> -> vector<16x128xf32>
    %37 = arith.addf %28, %36 : vector<16x128xf32>
    %c0_i32_27 = arith.constant 0 : i32
    %38 = arith.addi %0, %c0_i32_27 : i32
    %c2_28 = arith.constant 2 : index
    %39 = arith.index_cast %38 : i32 to index
    %c0_29 = arith.constant 0 : index
    %c0_30 = arith.constant 0 : index
    %40 = vector.load %arg2[%c2_28, %39, %c0_29, %c0_30] : memref<4x5x5x64xbf16, #tpu.memory_space<vmem>>, vector<1x4x4x64xbf16>
    %41 = vector.shape_cast %40 : vector<1x4x4x64xbf16> to vector<4x4x64xbf16>
    %42 = vector.shape_cast %41 : vector<4x4x64xbf16> to vector<16x64xbf16>
    %c4 = arith.constant 4 : index
    %c0_31 = arith.constant 0 : index
    %c0_32 = arith.constant 0 : index
    %43 = vector.load %arg3[%c4, %c0_31, %c0_32] : memref<16x64x128xbf16, #tpu.memory_space<vmem>>, vector<1x64x128xbf16>
    %44 = vector.shape_cast %43 : vector<1x64x128xbf16> to vector<64x128xbf16>
    %cst_33 = arith.constant dense<0.000000e+00> : vector<16x128xf32>
    %45 = tpu.matmul %42, %44, %cst_33 {dimension_numbers = #tpu.dot_dimension_numbers<[1], [0], [0], [1], [0, 0, 1, 1], [], []>} : vector<16x64xbf16>, vector<64x128xbf16>, vector<16x128xf32> -> vector<16x128xf32>
    %46 = arith.addf %37, %45 : vector<16x128xf32>
    %c0_i32_34 = arith.constant 0 : i32
    %47 = arith.addi %0, %c0_i32_34 : i32
    %c3_35 = arith.constant 3 : index
    %48 = arith.index_cast %47 : i32 to index
    %c0_36 = arith.constant 0 : index
    %c0_37 = arith.constant 0 : index
    %49 = vector.load %arg2[%c3_35, %48, %c0_36, %c0_37] : memref<4x5x5x64xbf16, #tpu.memory_space<vmem>>, vector<1x4x4x64xbf16>
    %50 = vector.shape_cast %49 : vector<1x4x4x64xbf16> to vector<4x4x64xbf16>
    %51 = vector.shape_cast %50 : vector<4x4x64xbf16> to vector<16x64xbf16>
    %c5 = arith.constant 5 : index
    %c0_38 = arith.constant 0 : index
    %c0_39 = arith.constant 0 : index
    %52 = vector.load %arg3[%c5, %c0_38, %c0_39] : memref<16x64x128xbf16, #tpu.memory_space<vmem>>, vector<1x64x128xbf16>
    %53 = vector.shape_cast %52 : vector<1x64x128xbf16> to vector<64x128xbf16>
    %cst_40 = arith.constant dense<0.000000e+00> : vector<16x128xf32>
    %54 = tpu.matmul %51, %53, %cst_40 {dimension_numbers = #tpu.dot_dimension_numbers<[1], [0], [0], [1], [0, 0, 1, 1], [], []>} : vector<16x64xbf16>, vector<64x128xbf16>, vector<16x128xf32> -> vector<16x128xf32>
    %55 = arith.addf %46, %54 : vector<16x128xf32>
    %c0_i32_41 = arith.constant 0 : i32
    %56 = arith.addi %0, %c0_i32_41 : i32
    %c2_42 = arith.constant 2 : index
    %57 = arith.index_cast %56 : i32 to index
    %c1_43 = arith.constant 1 : index
    %c0_44 = arith.constant 0 : index
    %58 = vector.load %arg2[%c2_42, %57, %c1_43, %c0_44] : memref<4x5x5x64xbf16, #tpu.memory_space<vmem>>, vector<1x4x4x64xbf16>
    %59 = vector.shape_cast %58 : vector<1x4x4x64xbf16> to vector<4x4x64xbf16>
    %60 = vector.shape_cast %59 : vector<4x4x64xbf16> to vector<16x64xbf16>
    %c6 = arith.constant 6 : index
    %c0_45 = arith.constant 0 : index
    %c0_46 = arith.constant 0 : index
    %61 = vector.load %arg3[%c6, %c0_45, %c0_46] : memref<16x64x128xbf16, #tpu.memory_space<vmem>>, vector<1x64x128xbf16>
    %62 = vector.shape_cast %61 : vector<1x64x128xbf16> to vector<64x128xbf16>
    %cst_47 = arith.constant dense<0.000000e+00> : vector<16x128xf32>
    %63 = tpu.matmul %60, %62, %cst_47 {dimension_numbers = #tpu.dot_dimension_numbers<[1], [0], [0], [1], [0, 0, 1, 1], [], []>} : vector<16x64xbf16>, vector<64x128xbf16>, vector<16x128xf32> -> vector<16x128xf32>
    %64 = arith.addf %55, %63 : vector<16x128xf32>
    %c0_i32_48 = arith.constant 0 : i32
    %65 = arith.addi %0, %c0_i32_48 : i32
    %c3_49 = arith.constant 3 : index
    %66 = arith.index_cast %65 : i32 to index
    %c1_50 = arith.constant 1 : index
    %c0_51 = arith.constant 0 : index
    %67 = vector.load %arg2[%c3_49, %66, %c1_50, %c0_51] : memref<4x5x5x64xbf16, #tpu.memory_space<vmem>>, vector<1x4x4x64xbf16>
    %68 = vector.shape_cast %67 : vector<1x4x4x64xbf16> to vector<4x4x64xbf16>
    %69 = vector.shape_cast %68 : vector<4x4x64xbf16> to vector<16x64xbf16>
    %c7 = arith.constant 7 : index
    %c0_52 = arith.constant 0 : index
    %c0_53 = arith.constant 0 : index
    %70 = vector.load %arg3[%c7, %c0_52, %c0_53] : memref<16x64x128xbf16, #tpu.memory_space<vmem>>, vector<1x64x128xbf16>
    %71 = vector.shape_cast %70 : vector<1x64x128xbf16> to vector<64x128xbf16>
    %cst_54 = arith.constant dense<0.000000e+00> : vector<16x128xf32>
    %72 = tpu.matmul %69, %71, %cst_54 {dimension_numbers = #tpu.dot_dimension_numbers<[1], [0], [0], [1], [0, 0, 1, 1], [], []>} : vector<16x64xbf16>, vector<64x128xbf16>, vector<16x128xf32> -> vector<16x128xf32>
    %73 = arith.addf %64, %72 : vector<16x128xf32>
    %c1_i32 = arith.constant 1 : i32
    %74 = arith.addi %0, %c1_i32 : i32
    %c0_55 = arith.constant 0 : index
    %75 = arith.index_cast %74 : i32 to index
    %c0_56 = arith.constant 0 : index
    %c0_57 = arith.constant 0 : index
    %76 = vector.load %arg2[%c0_55, %75, %c0_56, %c0_57] : memref<4x5x5x64xbf16, #tpu.memory_space<vmem>>, vector<1x4x4x64xbf16>
    %77 = vector.shape_cast %76 : vector<1x4x4x64xbf16> to vector<4x4x64xbf16>
    %78 = vector.shape_cast %77 : vector<4x4x64xbf16> to vector<16x64xbf16>
    %c8 = arith.constant 8 : index
    %c0_58 = arith.constant 0 : index
    %c0_59 = arith.constant 0 : index
    %79 = vector.load %arg3[%c8, %c0_58, %c0_59] : memref<16x64x128xbf16, #tpu.memory_space<vmem>>, vector<1x64x128xbf16>
    %80 = vector.shape_cast %79 : vector<1x64x128xbf16> to vector<64x128xbf16>
    %cst_60 = arith.constant dense<0.000000e+00> : vector<16x128xf32>
    %81 = tpu.matmul %78, %80, %cst_60 {dimension_numbers = #tpu.dot_dimension_numbers<[1], [0], [0], [1], [0, 0, 1, 1], [], []>} : vector<16x64xbf16>, vector<64x128xbf16>, vector<16x128xf32> -> vector<16x128xf32>
    %82 = arith.addf %73, %81 : vector<16x128xf32>
    %c1_i32_61 = arith.constant 1 : i32
    %83 = arith.addi %0, %c1_i32_61 : i32
    %c1_62 = arith.constant 1 : index
    %84 = arith.index_cast %83 : i32 to index
    %c0_63 = arith.constant 0 : index
    %c0_64 = arith.constant 0 : index
    %85 = vector.load %arg2[%c1_62, %84, %c0_63, %c0_64] : memref<4x5x5x64xbf16, #tpu.memory_space<vmem>>, vector<1x4x4x64xbf16>
    %86 = vector.shape_cast %85 : vector<1x4x4x64xbf16> to vector<4x4x64xbf16>
    %87 = vector.shape_cast %86 : vector<4x4x64xbf16> to vector<16x64xbf16>
    %c9 = arith.constant 9 : index
    %c0_65 = arith.constant 0 : index
    %c0_66 = arith.constant 0 : index
    %88 = vector.load %arg3[%c9, %c0_65, %c0_66] : memref<16x64x128xbf16, #tpu.memory_space<vmem>>, vector<1x64x128xbf16>
    %89 = vector.shape_cast %88 : vector<1x64x128xbf16> to vector<64x128xbf16>
    %cst_67 = arith.constant dense<0.000000e+00> : vector<16x128xf32>
    %90 = tpu.matmul %87, %89, %cst_67 {dimension_numbers = #tpu.dot_dimension_numbers<[1], [0], [0], [1], [0, 0, 1, 1], [], []>} : vector<16x64xbf16>, vector<64x128xbf16>, vector<16x128xf32> -> vector<16x128xf32>
    %91 = arith.addf %82, %90 : vector<16x128xf32>
    %c1_i32_68 = arith.constant 1 : i32
    %92 = arith.addi %0, %c1_i32_68 : i32
    %c0_69 = arith.constant 0 : index
    %93 = arith.index_cast %92 : i32 to index
    %c1_70 = arith.constant 1 : index
    %c0_71 = arith.constant 0 : index
    %94 = vector.load %arg2[%c0_69, %93, %c1_70, %c0_71] : memref<4x5x5x64xbf16, #tpu.memory_space<vmem>>, vector<1x4x4x64xbf16>
    %95 = vector.shape_cast %94 : vector<1x4x4x64xbf16> to vector<4x4x64xbf16>
    %96 = vector.shape_cast %95 : vector<4x4x64xbf16> to vector<16x64xbf16>
    %c10 = arith.constant 10 : index
    %c0_72 = arith.constant 0 : index
    %c0_73 = arith.constant 0 : index
    %97 = vector.load %arg3[%c10, %c0_72, %c0_73] : memref<16x64x128xbf16, #tpu.memory_space<vmem>>, vector<1x64x128xbf16>
    %98 = vector.shape_cast %97 : vector<1x64x128xbf16> to vector<64x128xbf16>
    %cst_74 = arith.constant dense<0.000000e+00> : vector<16x128xf32>
    %99 = tpu.matmul %96, %98, %cst_74 {dimension_numbers = #tpu.dot_dimension_numbers<[1], [0], [0], [1], [0, 0, 1, 1], [], []>} : vector<16x64xbf16>, vector<64x128xbf16>, vector<16x128xf32> -> vector<16x128xf32>
    %100 = arith.addf %91, %99 : vector<16x128xf32>
    %c1_i32_75 = arith.constant 1 : i32
    %101 = arith.addi %0, %c1_i32_75 : i32
    %c1_76 = arith.constant 1 : index
    %102 = arith.index_cast %101 : i32 to index
    %c1_77 = arith.constant 1 : index
    %c0_78 = arith.constant 0 : index
    %103 = vector.load %arg2[%c1_76, %102, %c1_77, %c0_78] : memref<4x5x5x64xbf16, #tpu.memory_space<vmem>>, vector<1x4x4x64xbf16>
    %104 = vector.shape_cast %103 : vector<1x4x4x64xbf16> to vector<4x4x64xbf16>
    %105 = vector.shape_cast %104 : vector<4x4x64xbf16> to vector<16x64xbf16>
    %c11 = arith.constant 11 : index
    %c0_79 = arith.constant 0 : index
    %c0_80 = arith.constant 0 : index
    %106 = vector.load %arg3[%c11, %c0_79, %c0_80] : memref<16x64x128xbf16, #tpu.memory_space<vmem>>, vector<1x64x128xbf16>
    %107 = vector.shape_cast %106 : vector<1x64x128xbf16> to vector<64x128xbf16>
    %cst_81 = arith.constant dense<0.000000e+00> : vector<16x128xf32>
    %108 = tpu.matmul %105, %107, %cst_81 {dimension_numbers = #tpu.dot_dimension_numbers<[1], [0], [0], [1], [0, 0, 1, 1], [], []>} : vector<16x64xbf16>, vector<64x128xbf16>, vector<16x128xf32> -> vector<16x128xf32>
    %109 = arith.addf %100, %108 : vector<16x128xf32>
    %c1_i32_82 = arith.constant 1 : i32
    %110 = arith.addi %0, %c1_i32_82 : i32
    %c2_83 = arith.constant 2 : index
    %111 = arith.index_cast %110 : i32 to index
    %c0_84 = arith.constant 0 : index
    %c0_85 = arith.constant 0 : index
    %112 = vector.load %arg2[%c2_83, %111, %c0_84, %c0_85] : memref<4x5x5x64xbf16, #tpu.memory_space<vmem>>, vector<1x4x4x64xbf16>
    %113 = vector.shape_cast %112 : vector<1x4x4x64xbf16> to vector<4x4x64xbf16>
    %114 = vector.shape_cast %113 : vector<4x4x64xbf16> to vector<16x64xbf16>
    %c12 = arith.constant 12 : index
    %c0_86 = arith.constant 0 : index
    %c0_87 = arith.constant 0 : index
    %115 = vector.load %arg3[%c12, %c0_86, %c0_87] : memref<16x64x128xbf16, #tpu.memory_space<vmem>>, vector<1x64x128xbf16>
    %116 = vector.shape_cast %115 : vector<1x64x128xbf16> to vector<64x128xbf16>
    %cst_88 = arith.constant dense<0.000000e+00> : vector<16x128xf32>
    %117 = tpu.matmul %114, %116, %cst_88 {dimension_numbers = #tpu.dot_dimension_numbers<[1], [0], [0], [1], [0, 0, 1, 1], [], []>} : vector<16x64xbf16>, vector<64x128xbf16>, vector<16x128xf32> -> vector<16x128xf32>
    %118 = arith.addf %109, %117 : vector<16x128xf32>
    %c1_i32_89 = arith.constant 1 : i32
    %119 = arith.addi %0, %c1_i32_89 : i32
    %c3_90 = arith.constant 3 : index
    %120 = arith.index_cast %119 : i32 to index
    %c0_91 = arith.constant 0 : index
    %c0_92 = arith.constant 0 : index
    %121 = vector.load %arg2[%c3_90, %120, %c0_91, %c0_92] : memref<4x5x5x64xbf16, #tpu.memory_space<vmem>>, vector<1x4x4x64xbf16>
    %122 = vector.shape_cast %121 : vector<1x4x4x64xbf16> to vector<4x4x64xbf16>
    %123 = vector.shape_cast %122 : vector<4x4x64xbf16> to vector<16x64xbf16>
    %c13 = arith.constant 13 : index
    %c0_93 = arith.constant 0 : index
    %c0_94 = arith.constant 0 : index
    %124 = vector.load %arg3[%c13, %c0_93, %c0_94] : memref<16x64x128xbf16, #tpu.memory_space<vmem>>, vector<1x64x128xbf16>
    %125 = vector.shape_cast %124 : vector<1x64x128xbf16> to vector<64x128xbf16>
    %cst_95 = arith.constant dense<0.000000e+00> : vector<16x128xf32>
    %126 = tpu.matmul %123, %125, %cst_95 {dimension_numbers = #tpu.dot_dimension_numbers<[1], [0], [0], [1], [0, 0, 1, 1], [], []>} : vector<16x64xbf16>, vector<64x128xbf16>, vector<16x128xf32> -> vector<16x128xf32>
    %127 = arith.addf %118, %126 : vector<16x128xf32>
    %c1_i32_96 = arith.constant 1 : i32
    %128 = arith.addi %0, %c1_i32_96 : i32
    %c2_97 = arith.constant 2 : index
    %129 = arith.index_cast %128 : i32 to index
    %c1_98 = arith.constant 1 : index
    %c0_99 = arith.constant 0 : index
    %130 = vector.load %arg2[%c2_97, %129, %c1_98, %c0_99] : memref<4x5x5x64xbf16, #tpu.memory_space<vmem>>, vector<1x4x4x64xbf16>
    %131 = vector.shape_cast %130 : vector<1x4x4x64xbf16> to vector<4x4x64xbf16>
    %132 = vector.shape_cast %131 : vector<4x4x64xbf16> to vector<16x64xbf16>
    %c14 = arith.constant 14 : index
    %c0_100 = arith.constant 0 : index
    %c0_101 = arith.constant 0 : index
    %133 = vector.load %arg3[%c14, %c0_100, %c0_101] : memref<16x64x128xbf16, #tpu.memory_space<vmem>>, vector<1x64x128xbf16>
    %134 = vector.shape_cast %133 : vector<1x64x128xbf16> to vector<64x128xbf16>
    %cst_102 = arith.constant dense<0.000000e+00> : vector<16x128xf32>
    %135 = tpu.matmul %132, %134, %cst_102 {dimension_numbers = #tpu.dot_dimension_numbers<[1], [0], [0], [1], [0, 0, 1, 1], [], []>} : vector<16x64xbf16>, vector<64x128xbf16>, vector<16x128xf32> -> vector<16x128xf32>
    %136 = arith.addf %127, %135 : vector<16x128xf32>
    %c1_i32_103 = arith.constant 1 : i32
    %137 = arith.addi %0, %c1_i32_103 : i32
    %c3_104 = arith.constant 3 : index
    %138 = arith.index_cast %137 : i32 to index
    %c1_105 = arith.constant 1 : index
    %c0_106 = arith.constant 0 : index
    %139 = vector.load %arg2[%c3_104, %138, %c1_105, %c0_106] : memref<4x5x5x64xbf16, #tpu.memory_space<vmem>>, vector<1x4x4x64xbf16>
    %140 = vector.shape_cast %139 : vector<1x4x4x64xbf16> to vector<4x4x64xbf16>
    %141 = vector.shape_cast %140 : vector<4x4x64xbf16> to vector<16x64xbf16>
    %c15 = arith.constant 15 : index
    %c0_107 = arith.constant 0 : index
    %c0_108 = arith.constant 0 : index
    %142 = vector.load %arg3[%c15, %c0_107, %c0_108] : memref<16x64x128xbf16, #tpu.memory_space<vmem>>, vector<1x64x128xbf16>
    %143 = vector.shape_cast %142 : vector<1x64x128xbf16> to vector<64x128xbf16>
    %cst_109 = arith.constant dense<0.000000e+00> : vector<16x128xf32>
    %144 = tpu.matmul %141, %143, %cst_109 {dimension_numbers = #tpu.dot_dimension_numbers<[1], [0], [0], [1], [0, 0, 1, 1], [], []>} : vector<16x64xbf16>, vector<64x128xbf16>, vector<16x128xf32> -> vector<16x128xf32>
    %145 = arith.addf %136, %144 : vector<16x128xf32>
    %c0_110 = arith.constant 0 : index
    %c0_111 = arith.constant 0 : index
    %146 = vector.load %arg4[%c0_110, %c0_111] : memref<1x128xf32, #tpu.memory_space<vmem>>, vector<1x128xf32>
    %147 = vector.broadcast %146 : vector<1x128xf32> to vector<16x128xf32>
    %148 = arith.addf %145, %147 : vector<16x128xf32>
    %cst_112 = arith.constant 0.000000e+00 : f32
    %149 = vector.broadcast %cst_112 : f32 to vector<16x128xf32>
    %150 = arith.maximumf %148, %149 : vector<16x128xf32>
    %151 = arith.truncf %150 : vector<16x128xf32> to vector<16x128xbf16>
    %c0_113 = arith.constant 0 : index
    %c0_114 = arith.constant 0 : index
    %c0_115 = arith.constant 0 : index
    %152 = vector.load %arg5[%c0_113, %c0_114, %c0_115] : memref<1x16x128xbf16, #tpu.memory_space<vmem>>, vector<1x16x128xbf16>
    %153 = vector.shape_cast %152 : vector<1x16x128xbf16> to vector<16x128xbf16>
    %154 = vector.shape_cast %151 : vector<16x128xbf16> to vector<1x16x128xbf16>
    tpu.vector_store %arg5[%c0_113, %c0_114, %c0_115], %154 {strides = array<i32>} : memref<1x16x128xbf16, #tpu.memory_space<vmem>>, vector<1x16x128xbf16>,
    return
  }
  func.func @transform_0(%arg0: i32, %arg1: i32) -> (i32, i32, i32, i32) {
    %c0_i32 = arith.constant 0 : i32
    %c0_i32_0 = arith.constant 0 : i32
    %c0_i32_1 = arith.constant 0 : i32
    %c0_i32_2 = arith.constant 0 : i32
    return %arg0, %c0_i32, %c0_i32_0, %c0_i32_1 : i32, i32, i32, i32
  }
  func.func @transform_1(%arg0: i32, %arg1: i32) -> (i32, i32, i32) {
    %c0_i32 = arith.constant 0 : i32
    %c0_i32_0 = arith.constant 0 : i32
    %c0_i32_1 = arith.constant 0 : i32
    %c0_i32_2 = arith.constant 0 : i32
    return %c0_i32, %c0_i32_0, %c0_i32_1 : i32, i32, i32
  }
  func.func @transform_2(%arg0: i32, %arg1: i32) -> (i32, i32) {
    %c0_i32 = arith.constant 0 : i32
    %c0_i32_0 = arith.constant 0 : i32
    %c0_i32_1 = arith.constant 0 : i32
    return %c0_i32, %c0_i32_0 : i32, i32
  }
  func.func @transform_3(%arg0: i32, %arg1: i32) -> (i32, i32, i32) {
    %c0_i32 = arith.constant 0 : i32
    %c0_i32_0 = arith.constant 0 : i32
    return %arg0, %arg1, %c0_i32 : i32, i32, i32
  }
}

module attributes {stable_mosaic.version = 11 : i64} {
  func.func @_fused_conv_kernel(%arg0: i32, %arg1: i32, %arg2: memref<1x6x6x128xbf16, #tpu.memory_space<vmem>>, %arg3: memref<9x128x128xbf16, #tpu.memory_space<vmem>>, %arg4: memref<1x128xf32, #tpu.memory_space<vmem>>, %arg5: memref<1x16x128xf32, #tpu.memory_space<vmem>>) attributes {dimension_semantics = [#tpu.dimension_semantics<parallel>, #tpu.dimension_semantics<parallel>], iteration_bounds = array<i64: 2, 1>, scalar_prefetch = 0 : i64, scratch_operands = 0 : i64, tpu.core_type = #tpu.core_type<tc>, window_params = [{transform_indices = @transform_0, window_bounds = array<i64: 1, 6, 6, 128>}, {pipeline_mode = #tpu.pipeline_mode<synchronous>, transform_indices = @transform_1, window_bounds = array<i64: 9, 128, 128>}, {pipeline_mode = #tpu.pipeline_mode<synchronous>, transform_indices = @transform_2, window_bounds = array<i64: 1, 128>}, {transform_indices = @transform_3, window_bounds = array<i64: 1, 16, 128>}]} {
    %c4_i32 = arith.constant 4 : i32
    %0 = arith.muli %arg1, %c4_i32 : i32
    %cst = arith.constant 0.000000e+00 : f32
    %1 = vector.broadcast %cst : f32 to vector<16x128xf32>
    %c0_i32 = arith.constant 0 : i32
    %2 = arith.addi %0, %c0_i32 : i32
    %c0 = arith.constant 0 : index
    %3 = arith.index_cast %2 : i32 to index
    %c0_0 = arith.constant 0 : index
    %c0_1 = arith.constant 0 : index
    %4 = vector.load %arg2[%c0, %3, %c0_0, %c0_1] : memref<1x6x6x128xbf16, #tpu.memory_space<vmem>>, vector<1x4x4x128xbf16>
    %5 = vector.shape_cast %4 : vector<1x4x4x128xbf16> to vector<4x4x128xbf16>
    %6 = vector.shape_cast %5 : vector<4x4x128xbf16> to vector<16x128xbf16>
    %c0_2 = arith.constant 0 : index
    %c0_3 = arith.constant 0 : index
    %c0_4 = arith.constant 0 : index
    %7 = vector.load %arg3[%c0_2, %c0_3, %c0_4] : memref<9x128x128xbf16, #tpu.memory_space<vmem>>, vector<1x128x128xbf16>
    %8 = vector.shape_cast %7 : vector<1x128x128xbf16> to vector<128x128xbf16>
    %cst_5 = arith.constant dense<0.000000e+00> : vector<16x128xf32>
    %9 = tpu.matmul %6, %8, %cst_5 {dimension_numbers = #tpu.dot_dimension_numbers<[1], [0], [0], [1], [0, 0, 1, 1], [], []>} : vector<16x128xbf16>, vector<128x128xbf16>, vector<16x128xf32> -> vector<16x128xf32>
    %10 = arith.addf %1, %9 : vector<16x128xf32>
    %c0_i32_6 = arith.constant 0 : i32
    %11 = arith.addi %0, %c0_i32_6 : i32
    %c0_7 = arith.constant 0 : index
    %12 = arith.index_cast %11 : i32 to index
    %c1 = arith.constant 1 : index
    %c0_8 = arith.constant 0 : index
    %13 = vector.load %arg2[%c0_7, %12, %c1, %c0_8] : memref<1x6x6x128xbf16, #tpu.memory_space<vmem>>, vector<1x4x4x128xbf16>
    %14 = vector.shape_cast %13 : vector<1x4x4x128xbf16> to vector<4x4x128xbf16>
    %15 = vector.shape_cast %14 : vector<4x4x128xbf16> to vector<16x128xbf16>
    %c1_9 = arith.constant 1 : index
    %c0_10 = arith.constant 0 : index
    %c0_11 = arith.constant 0 : index
    %16 = vector.load %arg3[%c1_9, %c0_10, %c0_11] : memref<9x128x128xbf16, #tpu.memory_space<vmem>>, vector<1x128x128xbf16>
    %17 = vector.shape_cast %16 : vector<1x128x128xbf16> to vector<128x128xbf16>
    %cst_12 = arith.constant dense<0.000000e+00> : vector<16x128xf32>
    %18 = tpu.matmul %15, %17, %cst_12 {dimension_numbers = #tpu.dot_dimension_numbers<[1], [0], [0], [1], [0, 0, 1, 1], [], []>} : vector<16x128xbf16>, vector<128x128xbf16>, vector<16x128xf32> -> vector<16x128xf32>
    %19 = arith.addf %10, %18 : vector<16x128xf32>
    %c0_i32_13 = arith.constant 0 : i32
    %20 = arith.addi %0, %c0_i32_13 : i32
    %c0_14 = arith.constant 0 : index
    %21 = arith.index_cast %20 : i32 to index
    %c2 = arith.constant 2 : index
    %c0_15 = arith.constant 0 : index
    %22 = vector.load %arg2[%c0_14, %21, %c2, %c0_15] : memref<1x6x6x128xbf16, #tpu.memory_space<vmem>>, vector<1x4x4x128xbf16>
    %23 = vector.shape_cast %22 : vector<1x4x4x128xbf16> to vector<4x4x128xbf16>
    %24 = vector.shape_cast %23 : vector<4x4x128xbf16> to vector<16x128xbf16>
    %c2_16 = arith.constant 2 : index
    %c0_17 = arith.constant 0 : index
    %c0_18 = arith.constant 0 : index
    %25 = vector.load %arg3[%c2_16, %c0_17, %c0_18] : memref<9x128x128xbf16, #tpu.memory_space<vmem>>, vector<1x128x128xbf16>
    %26 = vector.shape_cast %25 : vector<1x128x128xbf16> to vector<128x128xbf16>
    %cst_19 = arith.constant dense<0.000000e+00> : vector<16x128xf32>
    %27 = tpu.matmul %24, %26, %cst_19 {dimension_numbers = #tpu.dot_dimension_numbers<[1], [0], [0], [1], [0, 0, 1, 1], [], []>} : vector<16x128xbf16>, vector<128x128xbf16>, vector<16x128xf32> -> vector<16x128xf32>
    %28 = arith.addf %19, %27 : vector<16x128xf32>
    %c1_i32 = arith.constant 1 : i32
    %29 = arith.addi %0, %c1_i32 : i32
    %c0_20 = arith.constant 0 : index
    %30 = arith.index_cast %29 : i32 to index
    %c0_21 = arith.constant 0 : index
    %c0_22 = arith.constant 0 : index
    %31 = vector.load %arg2[%c0_20, %30, %c0_21, %c0_22] : memref<1x6x6x128xbf16, #tpu.memory_space<vmem>>, vector<1x4x4x128xbf16>
    %32 = vector.shape_cast %31 : vector<1x4x4x128xbf16> to vector<4x4x128xbf16>
    %33 = vector.shape_cast %32 : vector<4x4x128xbf16> to vector<16x128xbf16>
    %c3 = arith.constant 3 : index
    %c0_23 = arith.constant 0 : index
    %c0_24 = arith.constant 0 : index
    %34 = vector.load %arg3[%c3, %c0_23, %c0_24] : memref<9x128x128xbf16, #tpu.memory_space<vmem>>, vector<1x128x128xbf16>
    %35 = vector.shape_cast %34 : vector<1x128x128xbf16> to vector<128x128xbf16>
    %cst_25 = arith.constant dense<0.000000e+00> : vector<16x128xf32>
    %36 = tpu.matmul %33, %35, %cst_25 {dimension_numbers = #tpu.dot_dimension_numbers<[1], [0], [0], [1], [0, 0, 1, 1], [], []>} : vector<16x128xbf16>, vector<128x128xbf16>, vector<16x128xf32> -> vector<16x128xf32>
    %37 = arith.addf %28, %36 : vector<16x128xf32>
    %c1_i32_26 = arith.constant 1 : i32
    %38 = arith.addi %0, %c1_i32_26 : i32
    %c0_27 = arith.constant 0 : index
    %39 = arith.index_cast %38 : i32 to index
    %c1_28 = arith.constant 1 : index
    %c0_29 = arith.constant 0 : index
    %40 = vector.load %arg2[%c0_27, %39, %c1_28, %c0_29] : memref<1x6x6x128xbf16, #tpu.memory_space<vmem>>, vector<1x4x4x128xbf16>
    %41 = vector.shape_cast %40 : vector<1x4x4x128xbf16> to vector<4x4x128xbf16>
    %42 = vector.shape_cast %41 : vector<4x4x128xbf16> to vector<16x128xbf16>
    %c4 = arith.constant 4 : index
    %c0_30 = arith.constant 0 : index
    %c0_31 = arith.constant 0 : index
    %43 = vector.load %arg3[%c4, %c0_30, %c0_31] : memref<9x128x128xbf16, #tpu.memory_space<vmem>>, vector<1x128x128xbf16>
    %44 = vector.shape_cast %43 : vector<1x128x128xbf16> to vector<128x128xbf16>
    %cst_32 = arith.constant dense<0.000000e+00> : vector<16x128xf32>
    %45 = tpu.matmul %42, %44, %cst_32 {dimension_numbers = #tpu.dot_dimension_numbers<[1], [0], [0], [1], [0, 0, 1, 1], [], []>} : vector<16x128xbf16>, vector<128x128xbf16>, vector<16x128xf32> -> vector<16x128xf32>
    %46 = arith.addf %37, %45 : vector<16x128xf32>
    %c1_i32_33 = arith.constant 1 : i32
    %47 = arith.addi %0, %c1_i32_33 : i32
    %c0_34 = arith.constant 0 : index
    %48 = arith.index_cast %47 : i32 to index
    %c2_35 = arith.constant 2 : index
    %c0_36 = arith.constant 0 : index
    %49 = vector.load %arg2[%c0_34, %48, %c2_35, %c0_36] : memref<1x6x6x128xbf16, #tpu.memory_space<vmem>>, vector<1x4x4x128xbf16>
    %50 = vector.shape_cast %49 : vector<1x4x4x128xbf16> to vector<4x4x128xbf16>
    %51 = vector.shape_cast %50 : vector<4x4x128xbf16> to vector<16x128xbf16>
    %c5 = arith.constant 5 : index
    %c0_37 = arith.constant 0 : index
    %c0_38 = arith.constant 0 : index
    %52 = vector.load %arg3[%c5, %c0_37, %c0_38] : memref<9x128x128xbf16, #tpu.memory_space<vmem>>, vector<1x128x128xbf16>
    %53 = vector.shape_cast %52 : vector<1x128x128xbf16> to vector<128x128xbf16>
    %cst_39 = arith.constant dense<0.000000e+00> : vector<16x128xf32>
    %54 = tpu.matmul %51, %53, %cst_39 {dimension_numbers = #tpu.dot_dimension_numbers<[1], [0], [0], [1], [0, 0, 1, 1], [], []>} : vector<16x128xbf16>, vector<128x128xbf16>, vector<16x128xf32> -> vector<16x128xf32>
    %55 = arith.addf %46, %54 : vector<16x128xf32>
    %c2_i32 = arith.constant 2 : i32
    %56 = arith.addi %0, %c2_i32 : i32
    %c0_40 = arith.constant 0 : index
    %57 = arith.index_cast %56 : i32 to index
    %c0_41 = arith.constant 0 : index
    %c0_42 = arith.constant 0 : index
    %58 = vector.load %arg2[%c0_40, %57, %c0_41, %c0_42] : memref<1x6x6x128xbf16, #tpu.memory_space<vmem>>, vector<1x4x4x128xbf16>
    %59 = vector.shape_cast %58 : vector<1x4x4x128xbf16> to vector<4x4x128xbf16>
    %60 = vector.shape_cast %59 : vector<4x4x128xbf16> to vector<16x128xbf16>
    %c6 = arith.constant 6 : index
    %c0_43 = arith.constant 0 : index
    %c0_44 = arith.constant 0 : index
    %61 = vector.load %arg3[%c6, %c0_43, %c0_44] : memref<9x128x128xbf16, #tpu.memory_space<vmem>>, vector<1x128x128xbf16>
    %62 = vector.shape_cast %61 : vector<1x128x128xbf16> to vector<128x128xbf16>
    %cst_45 = arith.constant dense<0.000000e+00> : vector<16x128xf32>
    %63 = tpu.matmul %60, %62, %cst_45 {dimension_numbers = #tpu.dot_dimension_numbers<[1], [0], [0], [1], [0, 0, 1, 1], [], []>} : vector<16x128xbf16>, vector<128x128xbf16>, vector<16x128xf32> -> vector<16x128xf32>
    %64 = arith.addf %55, %63 : vector<16x128xf32>
    %c2_i32_46 = arith.constant 2 : i32
    %65 = arith.addi %0, %c2_i32_46 : i32
    %c0_47 = arith.constant 0 : index
    %66 = arith.index_cast %65 : i32 to index
    %c1_48 = arith.constant 1 : index
    %c0_49 = arith.constant 0 : index
    %67 = vector.load %arg2[%c0_47, %66, %c1_48, %c0_49] : memref<1x6x6x128xbf16, #tpu.memory_space<vmem>>, vector<1x4x4x128xbf16>
    %68 = vector.shape_cast %67 : vector<1x4x4x128xbf16> to vector<4x4x128xbf16>
    %69 = vector.shape_cast %68 : vector<4x4x128xbf16> to vector<16x128xbf16>
    %c7 = arith.constant 7 : index
    %c0_50 = arith.constant 0 : index
    %c0_51 = arith.constant 0 : index
    %70 = vector.load %arg3[%c7, %c0_50, %c0_51] : memref<9x128x128xbf16, #tpu.memory_space<vmem>>, vector<1x128x128xbf16>
    %71 = vector.shape_cast %70 : vector<1x128x128xbf16> to vector<128x128xbf16>
    %cst_52 = arith.constant dense<0.000000e+00> : vector<16x128xf32>
    %72 = tpu.matmul %69, %71, %cst_52 {dimension_numbers = #tpu.dot_dimension_numbers<[1], [0], [0], [1], [0, 0, 1, 1], [], []>} : vector<16x128xbf16>, vector<128x128xbf16>, vector<16x128xf32> -> vector<16x128xf32>
    %73 = arith.addf %64, %72 : vector<16x128xf32>
    %c2_i32_53 = arith.constant 2 : i32
    %74 = arith.addi %0, %c2_i32_53 : i32
    %c0_54 = arith.constant 0 : index
    %75 = arith.index_cast %74 : i32 to index
    %c2_55 = arith.constant 2 : index
    %c0_56 = arith.constant 0 : index
    %76 = vector.load %arg2[%c0_54, %75, %c2_55, %c0_56] : memref<1x6x6x128xbf16, #tpu.memory_space<vmem>>, vector<1x4x4x128xbf16>
    %77 = vector.shape_cast %76 : vector<1x4x4x128xbf16> to vector<4x4x128xbf16>
    %78 = vector.shape_cast %77 : vector<4x4x128xbf16> to vector<16x128xbf16>
    %c8 = arith.constant 8 : index
    %c0_57 = arith.constant 0 : index
    %c0_58 = arith.constant 0 : index
    %79 = vector.load %arg3[%c8, %c0_57, %c0_58] : memref<9x128x128xbf16, #tpu.memory_space<vmem>>, vector<1x128x128xbf16>
    %80 = vector.shape_cast %79 : vector<1x128x128xbf16> to vector<128x128xbf16>
    %cst_59 = arith.constant dense<0.000000e+00> : vector<16x128xf32>
    %81 = tpu.matmul %78, %80, %cst_59 {dimension_numbers = #tpu.dot_dimension_numbers<[1], [0], [0], [1], [0, 0, 1, 1], [], []>} : vector<16x128xbf16>, vector<128x128xbf16>, vector<16x128xf32> -> vector<16x128xf32>
    %82 = arith.addf %73, %81 : vector<16x128xf32>
    %c0_60 = arith.constant 0 : index
    %c0_61 = arith.constant 0 : index
    %83 = vector.load %arg4[%c0_60, %c0_61] : memref<1x128xf32, #tpu.memory_space<vmem>>, vector<1x128xf32>
    %84 = vector.broadcast %83 : vector<1x128xf32> to vector<16x128xf32>
    %85 = arith.addf %82, %84 : vector<16x128xf32>
    %c0_62 = arith.constant 0 : index
    %c0_63 = arith.constant 0 : index
    %c0_64 = arith.constant 0 : index
    %86 = vector.load %arg5[%c0_62, %c0_63, %c0_64] : memref<1x16x128xf32, #tpu.memory_space<vmem>>, vector<1x16x128xf32>
    %87 = vector.shape_cast %86 : vector<1x16x128xf32> to vector<16x128xf32>
    %88 = vector.shape_cast %85 : vector<16x128xf32> to vector<1x16x128xf32>
    tpu.vector_store %arg5[%c0_62, %c0_63, %c0_64], %88 {strides = array<i32>} : memref<1x16x128xf32, #tpu.memory_space<vmem>>, vector<1x16x128xf32>,
    return
  }
  func.func @transform_0(%arg0: i32, %arg1: i32) -> (i32, i32, i32, i32) {
    %c0_i32 = arith.constant 0 : i32
    %c0_i32_0 = arith.constant 0 : i32
    %c0_i32_1 = arith.constant 0 : i32
    %c0_i32_2 = arith.constant 0 : i32
    return %arg0, %c0_i32, %c0_i32_0, %c0_i32_1 : i32, i32, i32, i32
  }
  func.func @transform_1(%arg0: i32, %arg1: i32) -> (i32, i32, i32) {
    %c0_i32 = arith.constant 0 : i32
    %c0_i32_0 = arith.constant 0 : i32
    %c0_i32_1 = arith.constant 0 : i32
    %c0_i32_2 = arith.constant 0 : i32
    return %c0_i32, %c0_i32_0, %c0_i32_1 : i32, i32, i32
  }
  func.func @transform_2(%arg0: i32, %arg1: i32) -> (i32, i32) {
    %c0_i32 = arith.constant 0 : i32
    %c0_i32_0 = arith.constant 0 : i32
    %c0_i32_1 = arith.constant 0 : i32
    return %c0_i32, %c0_i32_0 : i32, i32
  }
  func.func @transform_3(%arg0: i32, %arg1: i32) -> (i32, i32, i32) {
    %c0_i32 = arith.constant 0 : i32
    %c0_i32_0 = arith.constant 0 : i32
    return %arg0, %arg1, %c0_i32 : i32, i32, i32
  }
}

</mosaic_0001>

<bundles_post_ra>
// kernel: encoder_forward.3
= control target key start
LH: loop header
LB: loop body
LE: loop exit
PB: predicated region body
PF: predicated region fallthrough
CT: control target
= control target key end

     0   :  { %s632_s12 = smov 0   ;;  %s634_s13 = smov 0   ;;  %s684_s0 = inlined_call_operand.vmem [shape: bf16[2,8,8,48], index: 0, kind: input, shape index: {}]   ;;  %s685_s1 = inlined_call_operand.vmem [shape: bf16[1,48,128], index: 1, kind: input, shape index: {}]   ;;  %s686_s2 = inlined_call_operand.vmem [shape: f32[1,128], index: 2, kind: input, shape index: {}]   ;;  %s687_s3 = inlined_call_operand.vmem [shape: bf16[2,64,128], index: 3, kind: output, shape index: {}]  }
   0x1   :  { %s636_s14 = smov 0  }
   0x2 LB: > { %s25_s15 = sadd.s32 1, %s606_s13  ;;  %p470_p0 = scmp.ge.s32.totalorder %s610_s14, 1  ;;  %s610_s14 = sphi %s636_s14, %s13_s14   ;;  %s606_s13 = sphi %s634_s13, %s689_s13   ;;  %s602_s12 = sphi %s632_s12, %s688_s12  }
   0x3   : > { %p27_p1 = scmp.ge.s32.totalorder %s25_s15, 2  ;;  %p151_p2 = scmp.lt.s32.totalorder %s610_s14, 3 }
   0x5   : > { %s691_s15 = smov (%p27_p1, %s25_s15), 0  ;;  %p152_p3 = pnand %p470_p0, %p151_p2 }
   0x6   : > { %v581_v0 = vld [vmem:[%s685_s1] sm:$0xff] (!%p152_p3)   ;;  %p179_p4 = scmp.lt.s32.totalorder (!%p152_p3), %s602_s12, 1  ;;  %v582_v1 = vld [vmem:[%s685_s1 + $0x8] sm:$0xff] (!%p152_p3)   ;;  %v583_v2 = vld [vmem:[%s685_s1 + $0x10] sm:$0xff] (!%p152_p3)   ;;  %vm257_vm0 = vcmask (!%p152_p3), 392192  }
   0x7   : > { %155 = sbr.rel (%p152_p3) target bundleno = 241 (0xf1), region = 32  ;;  %537 = vmatprep.subr.bf16.mxu0 (!%p152_p3), %v581_v0  ;;  %551 = vmatprep.subr.bf16.mxu1 (!%p152_p3), %v581_v0  ;;  %v475_v7 = vld [vmem:[%s686_s2] ss:$0 sm:$0xff] (!%p152_p3) }
   0x8   : > { %538 = vmatpush3.bf16.msra.mxu0 (!%p152_p3), %v581_v0  ;;  %554 = vmatpush3.bf16.msra.mxu1 (!%p152_p3), %v581_v0 }
   0x9   : > { %539 = vmatprep.subr.bf16.mxu0 (!%p152_p3), %v582_v1  ;;  %552 = vmatprep.subr.bf16.mxu1 (!%p152_p3), %v582_v1 }
   0xc   : > { %540 = vmatpush3.bf16.msra.mxu0 (!%p152_p3), %v582_v1  ;;  %555 = vmatpush3.bf16.msra.mxu1 (!%p152_p3), %v582_v1 }
   0xd   : > { %541 = vmatprep.subr.bf16.mxu0 (!%p152_p3), %v583_v2  ;;  %553 = vmatprep.subr.bf16.mxu1 (!%p152_p3), %v583_v2 }
   0xe   : > { %s693_s12 = smov (!%p179_p4, %s602_s12), 1 }
   0xf   : > { %s497_s22 = sshll.u32 %s693_s12, 5 }
  0x10   : > { %s183_s25 = scalar_lea.vmem %s684_s0, %s497_s22  ;;  %542 = vmatpush3.bf16.msra.mxu0 %v583_v2  ;;  %556 = vmatpush3.bf16.msra.mxu1 %v583_v2  ;;  %s192_s30 = scalar_lea.vmem %s687_s3, %s497_s22 }
  0x11   : > { %v584_v3 = vld [vmem:[%s183_s25] sm:$0xff]   ;;  %v585_v4 = vld [vmem:[%s183_s25 + $0x10] sm:$0xff]   ;;  %v586_v5 = vld [vmem:[%s183_s25 + $0x8] sm:$0xff]  }
  0x12   : > { %543 = vmatprep.mubr.msk.bf16.mxu0 %vm257_vm0, %v584_v3  ;;  %547 = vmatprep.mubr.msk.bf16.mxu1 %vm257_vm0, %v585_v4  ;;  %v587_v6 = vld [vmem:[%s183_s25 + $0x18] sm:$0xff]  }
  0x13   : > { %544 = vmatmul.mubr.msk.bf16.vlgmr.msra.gmra.mrb[0].mxu0 %vm257_vm0, %v586_v5  ;;  %548 = vmatmul.mubr.msk.bf16.vlgmr.msra.gmra.mrb[0].mxu1 %vm257_vm0, %v587_v6 }
  0xe6   : > { %v545_v8 = vpop.f32.mrb[0].mxu0  ;;  %v549_v9 = vpop.f32.mrb[0].mxu1 }
  0xe7   : > { %v313_v10 = vadd.f32 %v545_v8, %v475_v7  ;;  %v329_v11 = vadd.f32 %v549_v9, %v475_v7  ;;  %v304_v12 = vpop.f32.mrb[1].mxu0  ;;  %v320_v13 = vpop.f32.mrb[1].mxu1 }
  0xe8   : > { %v305_v14 = vadd.f32 %v475_v7, %v304_v12  ;;  %v321_v15 = vadd.f32 %v475_v7, %v320_v13  ;;  %v546_v16 = vpop.f32.mrb[2].mxu0  ;;  %v550_v17 = vpop.f32.mrb[2].mxu1 }
  0xe9   : > { %v316_v18 = vadd.f32 %v546_v16, %v475_v7  ;;  %v332_v19 = vadd.f32 %v550_v17, %v475_v7  ;;  %v307_v20 = vpop.f32.mrb[3].mxu0  ;;  %v323_v21 = vpop.f32.mrb[3].mxu1  ;;  %v337_v24 = vmax.f32 %v313_v10, 0.0  ;;  %v341_v25 = vmax.f32 %v329_v11, 0.0 }
  0xea   : > { %v308_v22 = vadd.f32 %v475_v7, %v307_v20  ;;  %v324_v23 = vadd.f32 %v475_v7, %v323_v21  ;;  %v335_v28 = vmax.f32 %v305_v14, 0.0  ;;  %v339_v29 = vmax.f32 %v321_v15, 0.0 }
  0xeb   : > { %v338_v26 = vmax.f32 %v316_v18, 0.0  ;;  %v342_v27 = vmax.f32 %v332_v19, 0.0 }
  0xec   : > { %v336_v30 = vmax.f32 %v308_v22, 0.0  ;;  %v340_v31 = vmax.f32 %v324_v23, 0.0 }
  0xed   : > { %v515_v32 = vpack.c.bf16 %v338_v26, %v337_v24  ;;  %v525_v33 = vpack.c.bf16 %v342_v27, %v341_v25 }
  0xee   : > { %v510_v34 = vpack.c.bf16 %v336_v30, %v335_v28  ;;  %v520_v35 = vpack.c.bf16 %v340_v31, %v339_v29 }
  0xef   : > { %527 = vst [vmem:[%s192_s30 + $0x8] sm:$0xff] %v515_v32   ;;  %529 = vst [vmem:[%s192_s30 + $0x18] sm:$0xff] %v525_v33  }
  0xf0   : > { %511 = vst [vmem:[%s192_s30] sm:$0xff] %v510_v34   ;;  %528 = vst [vmem:[%s192_s30 + $0x10] sm:$0xff] %v520_v35  }
  0xf1 PF: > { %s13_s14 = sadd.s32 1, %s610_s14   ;;  %s688_s12 = smov %s606_s13 }
  0xf2   : > { %p10_p5 = scmp.ge.s32.totalorder %s13_s14, 4   ;;  %s689_s13 = smov %s691_s15 }
  0xf4   :  { %12 = sbr.rel (!%p10_p5) target bundleno = 2 (0x2), region = 63 }

// kernel: encoder_forward.4
= control target key start
LH: loop header
LB: loop body
LE: loop exit
PB: predicated region body
PF: predicated region fallthrough
CT: control target
= control target key end

     0   :  { %s3480_s12 = smov 0   ;;  %s3482_s13 = smov 0   ;;  %s4010_s0 = inlined_call_operand.vmem [shape: bf16[8,5,5,64], index: 0, kind: input, shape index: {}]   ;;  %s4011_s1 = inlined_call_operand.vmem [shape: bf16[16,64,128], index: 1, kind: input, shape index: {}]   ;;  %s4012_s2 = inlined_call_operand.vmem [shape: f32[1,128], index: 2, kind: input, shape index: {}]   ;;  %s4013_s3 = inlined_call_operand.vmem [shape: bf16[2,16,128], index: 3, kind: output, shape index: {}]  }
   0x1   :  { %s3484_s14 = smov 0  }
   0x2 LB: > { %s25_s15 = sadd.s32 1, %s3451_s13  ;;  %p2731_p0 = scmp.ge.s32.totalorder %s3455_s14, 1  ;;  %s3455_s14 = sphi %s3484_s14, %s13_s14   ;;  %s3451_s13 = sphi %s3482_s13, %s4021_s13   ;;  %s3447_s12 = sphi %s3480_s12, %s4020_s12  }
   0x3   : > { %p27_p1 = scmp.ge.s32.totalorder %s25_s15, 2  ;;  %p153_p2 = scmp.lt.s32.totalorder %s3455_s14, 3 }
   0x5   : > { %s4023_s15 = smov (%p27_p1, %s25_s15), 0  ;;  %p154_p3 = pnand %p2731_p0, %p153_p2 }
   0x6   : > { %v3337_v0 = vld [vmem:[%s4011_s1 + $0x20] sm:$0xff] (!%p154_p3)   ;;  %v3457_v1 = vmov (!%p154_p3), 0.0   ;;  %v3339_v3 = vld [vmem:[%s4011_s1 + $0x28] sm:$0xff] (!%p154_p3)   ;;  %vm3458_vm0 = vmmov (!%p154_p3), 0   ;;  %s2732_s22 = sshll.u32 (!%p154_p3), %s3447_s12, 2  ;;  %v240_v5 = vlaneseq (!%p154_p3)  ;;  %v3341_v6 = vld [vmem:[%s4011_s1 + $0x30] sm:$0xff] (!%p154_p3)  }
   0x7   : > { %157 = sbr.rel (%p154_p3) target bundleno = 374 (0x176), region = 32  ;;  %3117 = vmatprep.subr.bf16.mxu0 (!%p154_p3), %v3457_v1  ;;  %3129 = vmatprep.subr.bf16.mxu1 (!%p154_p3), %v3457_v1  ;;  %v3338_v2 = vld [vmem:[%s4011_s1] sm:$0xff] (!%p154_p3)   ;;  %v3340_v4 = vld [vmem:[%s4011_s1 + $0x8] sm:$0xff] (!%p154_p3)   ;;  %p183_p4 = scmp.lt.s32.totalorder (!%p154_p3), %s2732_s22, 7  ;;  %v3342_v7 = vld [vmem:[%s4011_s1 + $0x10] sm:$0xff] (!%p154_p3)   ;;  %vm276_vm1 = vcmask (!%p154_p3), 523264  }
   0x8   : > { %3118 = vmatpush3.bf16.msra.mxu0 (!%p154_p3), %v3337_v0  ;;  %3125 = vmatprep.mubr.msk.bf16.mxu0 (!%p154_p3), %vm3458_vm0, %v3457_v1  ;;  %v3343_v8 = vld [vmem:[%s4011_s1 + $0x38] sm:$0xff] (!%p154_p3)   ;;  %v3459_v10 = vmov (!%p154_p3), 1983009808   ;;  %v241_v12 = vshrl.u32 (!%p154_p3), %v240_v5, 7  ;;  %v3349_v19 = vld [vmem:[%s4011_s1 + $0x40] sm:$0xff] (!%p154_p3)   ;;  %v3351_v23 = vld [vmem:[%s4011_s1 + $0x48] sm:$0xff] (!%p154_p3)  }
   0x9   : > { %3130 = vmatpush3.bf16.msra.mxu1 (!%p154_p3), %v3338_v2  ;;  %3119 = vmatprep.subr.bf16.mxu0 (!%p154_p3), %v3457_v1  ;;  %v3344_v9 = vld [vmem:[%s4011_s1 + $0x18] sm:$0xff] (!%p154_p3)   ;;  %v238_v11 = vunpack.c.l.s4 (!%p154_p3), %v3459_v10  ;;  %v3350_v20 = vld [vmem:[%s4011_s1 + $0x60] sm:$0xff] (!%p154_p3)   ;;  %v3352_v24 = vld [vmem:[%s4011_s1 + $0x68] sm:$0xff] (!%p154_p3)   ;;  %vm450_vm2 = vsmask.f32 (!%p154_p3), 1280  ;;  %p190_p5 = scmp.lt.s32.totalorder (!%p154_p3), %s3447_s12, 1 }
   0xa   : > { %3131 = vmatprep.subr.bf16.mxu1 (!%p154_p3), %v3457_v1  ;;  %3137 = vmatprep.mubr.msk.bf16.mxu1 (!%p154_p3), %vm3458_vm0, %v3457_v1  ;;  %v3353_v28 = vld [vmem:[%s4011_s1 + $0x50] sm:$0xff] (!%p154_p3)   ;;  %vm451_vm3 = vsmask.f32 (!%p154_p3), 3336  ;;  %vm453_vm5 = vsmask.f32 (!%p154_p3), 5392  ;;  %v3355_v42 = vld [vmem:[%s4011_s1 + $0x58] sm:$0xff] (!%p154_p3)  }
   0xb   : > { %v239_v15 = vunpack.c.0.s8 (!%p154_p3), %v238_v11  ;;  %v3354_v29 = vld [vmem:[%s4011_s1 + $0x70] sm:$0xff] (!%p154_p3)   ;;  %vm3580_vm4 = vmor (!%p154_p3), %vm450_vm2, %vm451_vm3  ;;  %vm455_vm6 = vsmask.f32 (!%p154_p3), 7448  ;;  %v3356_v52 = vld [vmem:[%s4011_s1 + $0x78] sm:$0xff] (!%p154_p3)  }
   0xc   : > { %3120 = vmatpush3.bf16.msra.mxu0 (!%p154_p3), %v3339_v3  ;;  %vm3591_vm7 = vmor (!%p154_p3), %vm3580_vm4, %vm453_vm5 }
   0xd   : > { %3132 = vmatpush3.bf16.msra.mxu1 (!%p154_p3), %v3340_v4  ;;  %3121 = vmatprep.subr.bf16.mxu0 (!%p154_p3), %v3457_v1  ;;  %v3544_v16 = vsub.s32 (!%p154_p3), %v239_v15, %v241_v12  ;;  %vm3603_vm8 = vmor (!%p154_p3), %vm3591_vm7, %vm455_vm6 }
   0xe   : > { %s4025_s22 = smov (!%p183_p4, %s2732_s22), 7  ;;  %3133 = vmatprep.subr.bf16.mxu1 %v3457_v1  ;;  %s4027_s12 = smov (!%p190_p5, %s3447_s12), 1 }
   0xf   : > { %s3309_s29 = smul.u32 20, %s4025_s22  ;;  %s3029_s17 = sshll.u32 %s4027_s12, 3 }
  0x10   : > { %3122 = vmatpush3.bf16.msra.mxu0 %v3341_v6  ;;  %s197_s20 = scalar_lea.vmem %s4013_s3, %s3029_s17 }
  0x11   : > { %s3538_s9 = scalar_lea.vmem %s4010_s0, %s3309_s29  ;;  %3134 = vmatpush3.bf16.msra.mxu1 %v3342_v7  ;;  %3123 = vmatprep.subr.bf16.mxu0 %v3457_v1 }
  0x12   : > { %v3417_v13 = vld.sshfl [vmem:[%s3538_s9 + $0x14] sm:$0xf pattern:$0x76325410]  ;;  %3135 = vmatprep.subr.bf16.mxu1 %v3457_v1 }
  0x13   : > { %v3418_v14 = vld.sshfl [vmem:[%s3538_s9 + $0x1c] sm:$0xf pattern:$0x76325410] }
  0x14   : > { %v3419_v17 = vld.sshfl [vmem:[%s3538_s9] sm:$0xf pattern:$0x76325410]  ;;  %3124 = vmatpush3.bf16.msra.mxu0 %v3343_v8  ;;  %v251_v21 = vcombine.low %v3417_v13, %v3418_v14 }
  0x15   : > { %v3420_v18 = vld.sshfl [vmem:[%s3538_s9 + $0x8] sm:$0xf pattern:$0x76325410]  ;;  %3136 = vmatpush3.bf16.msra.mxu1 %v3344_v9  ;;  %3141 = vmatprep.subr.bf16.mxu0 %v3457_v1 }
  0x16   : > { %3153 = vmatprep.subr.bf16.mxu1 %v3457_v1  ;;  %v341_v22 = vcombine.low %v3419_v17, %v3420_v18  ;;  %v2758_v25 = vld.sshfl [vmem:[%s3538_s9] sm:$0x13 pattern:$0x76325410] }
  0x17   : > { %3126 = vmatmul.mubr.msk.bf16.vlgmr.msra.gmra.mrb[0].mxu0 %vm276_vm1, %v251_v21  ;;  %v2759_v26 = vld.sshfl [vmem:[%s3538_s9 + $0x4] sm:$0x13 pattern:$0x76325410]  ;;  %v425_v27 = vcombine.high %v2758_v25, %v2758_v25  ;;  %v458_v36 = vshrl.u32 %v2758_v25, 16  ;;  %v461_v37 = vshll.u32 %v2758_v25, 16 }
  0x18   : > { %3138 = vmatmul.mubr.msk.bf16.vlgmr.msra.gmra.mrb[0].mxu1 %vm276_vm1, %v341_v22  ;;  %3142 = vmatpush3.bf16.msra.mxu0 %v3349_v19  ;;  %v2760_v30 = vld.sshfl [vmem:[%s3538_s9 + $0x8] sm:$0x13 pattern:$0x76325410]  ;;  %v433_v31 = vcombine.high %v2759_v26, %v2759_v26  ;;  %v472_v39 = vshrl.u32 %v2759_v26, 16  ;;  %v475_v40 = vshll.u32 %v2759_v26, 16 }
  0x19   : > { %3154 = vmatpush3.bf16.msra.mxu1 %v3350_v20  ;;  %3143 = vmatprep.subr.bf16.mxu0 %v3457_v1  ;;  %v2761_v32 = vld.sshfl [vmem:[%s3538_s9 + $0xc] sm:$0x13 pattern:$0x76325410]  ;;  %v441_v33 = vcombine.high %v2760_v30, %v2760_v30  ;;  %v467_v38 = vshll.u32 %v425_v27, 16  ;;  %v460_v44 = vrot.slane %v458_v36, 6 }
  0x1a   : > { %3155 = vmatprep.subr.bf16.mxu1 %v3457_v1  ;;  %3149 = vmatprep.mubr.msk.bf16.mxu0 %vm3458_vm0, %v3457_v1  ;;  %v449_v35 = vcombine.high %v2761_v32, %v2761_v32  ;;  %v481_v41 = vshll.u32 %v433_v31, 16  ;;  %v463_v45 = vrot.slane %v461_v37, 7  ;;  %v486_v46 = vshrl.u32 %v2760_v30, 16 }
  0x1b   : > { %3161 = vmatprep.mubr.msk.bf16.mxu1 %vm3458_vm0, %v3457_v1  ;;  %v489_v47 = vshll.u32 %v2760_v30, 16  ;;  %v469_v48 = vrot.slane %v467_v38, 7  ;;  %v474_v49 = vrot.slane %v472_v39, 6  ;;  %v477_v50 = vrot.slane %v475_v40, 7 }
  0x1c   : > { %3144 = vmatpush3.bf16.msra.mxu0 %v3351_v23  ;;  %v483_v51 = vrot.slane %v481_v41, 7  ;;  %v464_v53 = vor.u32 %v463_v45, %v460_v44  ;;  %v488_v54 = vrot.slane %v486_v46, 6  ;;  %v495_v56 = vshll.u32 %v441_v33, 16 }
  0x1d   : > { %3156 = vmatpush3.bf16.msra.mxu1 %v3352_v24  ;;  %3145 = vmatprep.subr.bf16.mxu0 %v3457_v1  ;;  %v491_v55 = vrot.slane %v489_v47, 7  ;;  %v478_v58 = vor.u32 %v477_v50, %v474_v49  ;;  %v500_v59 = vshrl.u32 %v2761_v32, 16  ;;  %v503_v60 = vshll.u32 %v2761_v32, 16  ;;  %v3357_v50 = vld [vmem:[%s4011_s1 + $0x80] sm:$0xff]  }
  0x1e   : > { %3157 = vmatprep.subr.bf16.mxu1 %v3457_v1  ;;  %v509_v61 = vshll.u32 %v449_v35, 16  ;;  %v465_v62 = vrot.slane %v464_v53, 2  ;;  %v497_v0 = vrot.slane %v495_v56, 7 }
  0x1f   : > { %v492_v63 = vor.u32 %v491_v55, %v488_v54  ;;  %v2779_v2 = vld.sshfl [vmem:[%s3538_s9 + $0x14] sm:$0x13 pattern:$0x76325410]  ;;  %v479_v3 = vrot.slane %v478_v58, 2  ;;  %v502_v4 = vrot.slane %v500_v59, 6 }
  0x20   : > { %3146 = vmatpush3.bf16.msra.mxu0 %v3353_v28  ;;  %v505_v5 = vrot.slane %v503_v60, 7  ;;  %v511_v6 = vrot.slane %v509_v61, 7  ;;  %v470_v7 = vsel %vm3603_vm8, %v465_v62, %v469_v48  ;;  %v2780_v9 = vld.sshfl [vmem:[%s3538_s9 + $0x18] sm:$0x13 pattern:$0x76325410]  ;;  %v624_v10 = vcombine.high %v2779_v2, %v2779_v2 }
  0x21   : > { %3158 = vmatpush3.bf16.msra.mxu1 %v3354_v29  ;;  %3147 = vmatprep.subr.bf16.mxu0 %v3457_v1  ;;  %v493_v8 = vrot.slane %v492_v63, 2  ;;  %v650_v11 = vshrl.u32 %v2779_v2, 16  ;;  %v3613_v12 = vsel %vm3603_vm8, %v479_v3, %v483_v51  ;;  %v2781_v14 = vld.sshfl [vmem:[%s3538_s9 + $0x1c] sm:$0x13 pattern:$0x76325410]  ;;  %v632_v15 = vcombine.high %v2780_v9, %v2780_v9 }
  0x22   : > { %3159 = vmatprep.subr.bf16.mxu1 %v3457_v1  ;;  %v506_v13 = vor.u32 %v505_v5, %v502_v4  ;;  %v653_v17 = vshll.u32 %v2779_v2, 16  ;;  %v522_v19 = vcombine.low %v470_v7, %v3613_v12  ;;  %v2782_v20 = vld.sshfl [vmem:[%s3538_s9 + $0x20] sm:$0x13 pattern:$0x76325410]  ;;  %v640_v21 = vcombine.high %v2781_v14, %v2781_v14  ;;  %v3361_v4 = vld [vmem:[%s4011_s1 + $0x90] sm:$0xff]  }
  0x23   : > { %v3620_v18 = vsel %vm3603_vm8, %v493_v8, %v497_v0  ;;  %v652_v22 = vrot.slane %v650_v11, 6  ;;  %v648_v24 = vcombine.high %v2782_v20, %v2782_v20  ;;  %v659_v26 = vshll.u32 %v624_v10, 16  ;;  %v3359_v0 = vld [vmem:[%s4011_s1 + $0x88] sm:$0xff]   ;;  %v3358_v11 = vld [vmem:[%s4011_s1 + $0xa0] sm:$0xff]  }
  0x24   : > { %3148 = vmatpush3.bf16.msra.mxu0 %v3355_v42  ;;  %v507_v23 = vrot.slane %v506_v13, 2  ;;  %v655_v25 = vrot.slane %v653_v17, 7  ;;  %v530_v27 = vrot.slane %v522_v19, %v3544_v16  ;;  %v664_v28 = vshrl.u32 %v2780_v9, 16 }
  0x25   : > { %3160 = vmatpush3.bf16.msra.mxu1 %v3356_v52  ;;  %3165 = vmatprep.subr.bf16.mxu0 %v3457_v1  ;;  %v667_v29 = vshll.u32 %v2780_v9, 16  ;;  %v673_v30 = vshll.u32 %v632_v15, 16  ;;  %v661_v33 = vrot.slane %v659_v26, 7  ;;  %v678_v34 = vshrl.u32 %v2781_v14, 16 }
  0x26   : > { %3177 = vmatprep.subr.bf16.mxu1 %v3457_v1  ;;  %v3627_v31 = vsel %vm3603_vm8, %v507_v23, %v511_v6  ;;  %v656_v32 = vor.u32 %v655_v25, %v652_v22  ;;  %v666_v36 = vrot.slane %v664_v28, 6  ;;  %v681_v41 = vshll.u32 %v2781_v14, 16  ;;  %v3421_v5 = vld.sshfl [vmem:[%s3538_s9 + $0x28] sm:$0xf pattern:$0x76325410] }
  0x27   : > { %v523_v35 = vcombine.low %v3620_v18, %v3627_v31  ;;  %v669_v37 = vrot.slane %v667_v29, 7  ;;  %v675_v38 = vrot.slane %v673_v30, 7  ;;  %v680_v40 = vrot.slane %v678_v34, 6  ;;  %v3363_v14 = vld [vmem:[%s4011_s1 + $0x98] sm:$0xff]   ;;  %v3369_v23 = vld [vmem:[%s4011_s1 + $0xc0] sm:$0xff]  }
  0x28   : > { %v657_v39 = vrot.slane %v656_v32, 2  ;;  %v687_v42 = vshll.u32 %v640_v21, 16  ;;  %v692_v45 = vshrl.u32 %v2782_v20, 16  ;;  %v695_v46 = vshll.u32 %v2782_v20, 16  ;;  %v3360_v20 = vld [vmem:[%s4011_s1 + $0xa8] sm:$0xff]  }
  0x29   : > { %v537_v43 = vrot.slane %v523_v35, %v3544_v16  ;;  %v670_v44 = vor.u32 %v669_v37, %v666_v36  ;;  %v683_v48 = vrot.slane %v681_v41, 7  ;;  %v701_v49 = vshll.u32 %v648_v24, 16  ;;  %v3422_v6 = vld.sshfl [vmem:[%s3538_s9 + $0x30] sm:$0xf pattern:$0x76325410] }
  0x2a   : > { %v662_v47 = vsel %vm3603_vm8, %v657_v39, %v661_v33  ;;  %v694_v53 = vrot.slane %v692_v45, 6  ;;  %v697_v54 = vrot.slane %v695_v46, 7  ;;  %v689_v56 = vrot.slane %v687_v42, 7  ;;  %v3362_v41 = vld [vmem:[%s4011_s1 + $0xb0] sm:$0xff]   ;;  %v3371_v46 = vld [vmem:[%s4011_s1 + $0xc8] sm:$0xff]  }
  0x2b   : > { %v538_v51 = vcombine.low %v530_v27, %v537_v43  ;;  %v671_v52 = vrot.slane %v670_v44, 2  ;;  %v684_v55 = vor.u32 %v683_v48, %v680_v40  ;;  %v1718_v58 = vcombine.low %v3613_v12, %v3620_v18  ;;  %v3678_v15 = vld.sshfl [vmem:[%s3538_s9 + $0x3c] sm:$0xf pattern:$0x76325410] }
  0x2c   : > { %v698_v60 = vor.u32 %v697_v54, %v694_v53  ;;  %v703_v61 = vrot.slane %v701_v49, 7  ;;  %v3681_v19 = vld.sshfl [vmem:[%s3538_s9 + $0x44] sm:$0xf pattern:$0x76325410]  ;;  %v837_v22 = vcombine.low %v3421_v5, %v3422_v6 }
  0x2d   : > { %3150 = vmatmul.mubr.msk.bf16.vlgmr.msra.gmra.mrb[4].mxu0 %vm276_vm1, %v538_v51  ;;  %v3642_v59 = vsel %vm3603_vm8, %v671_v52, %v675_v38  ;;  %v685_v62 = vrot.slane %v684_v55, 2  ;;  %v2834_v21 = vld.sshfl [vmem:[%s3538_s9 + $0x28] sm:$0x13 pattern:$0x76325410]  ;;  %v3364_v55 = vld [vmem:[%s4011_s1 + $0xb8] sm:$0xff]  }
  0x2e   : > { %v714_v63 = vcombine.low %v662_v47, %v3642_v59  ;;  %3166 = vmatpush3.bf16.msra.mxu0 %v3357_v50  ;;  %3173 = vmatprep.mubr.msk.bf16.mxu0 %vm3458_vm0, %v3457_v1  ;;  %v699_v2 = vrot.slane %v698_v60, 2  ;;  %v2835_v24 = vld.sshfl [vmem:[%s3538_s9 + $0x2c] sm:$0x13 pattern:$0x76325410]  ;;  %v1030_v25 = vcombine.high %v2834_v21, %v2834_v21  ;;  %v1056_v26 = vshrl.u32 %v2834_v21, 16 }
  0x2f   : > { %3167 = vmatprep.subr.bf16.mxu0 %v3457_v1  ;;  %v3653_v3 = vsel %vm3603_vm8, %v685_v62, %v689_v56  ;;  %v1059_v27 = vshll.u32 %v2834_v21, 16  ;;  %v2836_v28 = vld.sshfl [vmem:[%s3538_s9 + $0x30] sm:$0x13 pattern:$0x76325410]  ;;  %v1038_v29 = vcombine.high %v2835_v24, %v2835_v24  ;;  %v1070_v30 = vshrl.u32 %v2835_v24, 16 }
  0x30   : > { %v3662_v7 = vsel %vm3603_vm8, %v699_v2, %v703_v61  ;;  %v1910_v8 = vcombine.low %v3642_v59, %v3653_v3  ;;  %v722_v10 = vrot.slane %v714_v63, %v3544_v16  ;;  %v1073_v32 = vshll.u32 %v2835_v24, 16  ;;  %v2837_v33 = vld.sshfl [vmem:[%s3538_s9 + $0x34] sm:$0x13 pattern:$0x76325410]  ;;  %v3395_v59 = vld [vmem:[%s4011_s1 + $0x158] sm:$0xff]  }
  0x31   : > { %v715_v9 = vcombine.low %v3653_v3, %v3662_v7  ;;  %v1046_v34 = vcombine.high %v2836_v28, %v2836_v28  ;;  %v1058_v35 = vrot.slane %v1056_v26, 6  ;;  %v1061_v36 = vrot.slane %v1059_v27, 7  ;;  %v3373_v63 = vld [vmem:[%s4011_s1 + $0xd0] sm:$0xff]  }
  0x32   : > { %3168 = vmatpush3.bf16.msra.mxu0 %v3359_v0  ;;  %v1054_v37 = vcombine.high %v2837_v33, %v2837_v33  ;;  %v1065_v38 = vshll.u32 %v1030_v25, 16  ;;  %v1072_v39 = vrot.slane %v1070_v30, 6  ;;  %v1075_v40 = vrot.slane %v1073_v32, 7 }
  0x33   : > { %3169 = vmatprep.subr.bf16.mxu0 %v3457_v1  ;;  %v729_v13 = vrot.slane %v715_v9, %v3544_v16  ;;  %v1062_v42 = vor.u32 %v1061_v36, %v1058_v35  ;;  %v1079_v43 = vshll.u32 %v1038_v29, 16  ;;  %v1084_v44 = vshrl.u32 %v2836_v28, 16  ;;  %v2855_v6 = vld.sshfl [vmem:[%s3538_s9 + $0x3c] sm:$0x13 pattern:$0x76325410] }
  0x34   : > { %v1087_v45 = vshll.u32 %v2836_v28, 16  ;;  %v1067_v47 = vrot.slane %v1065_v38, 7  ;;  %v1076_v48 = vor.u32 %v1075_v40, %v1072_v39  ;;  %v1093_v49 = vshll.u32 %v1046_v34, 16  ;;  %v3375_v28 = vld [vmem:[%s4011_s1 + $0xd8] sm:$0xff]  }
  0x35   : > { %v730_v17 = vcombine.low %v722_v10, %v729_v13  ;;  %v1098_v50 = vshrl.u32 %v2837_v33, 16  ;;  %v1063_v51 = vrot.slane %v1062_v42, 2  ;;  %v1081_v52 = vrot.slane %v1079_v43, 7 }
  0x36   : > { %3170 = vmatpush3.bf16.msra.mxu0 %v3361_v4  ;;  %v1086_v53 = vrot.slane %v1084_v44, 6  ;;  %v1089_v54 = vrot.slane %v1087_v45, 7  ;;  %v944_v56 = vcombine.low %v3678_v15, %v3681_v19  ;;  %v1077_v60 = vrot.slane %v1076_v48, 2 }
  0x37   : > { %3171 = vmatprep.subr.bf16.mxu0 %v3457_v1  ;;  %3162 = vmatmul.mubr.msk.bf16.vlgmr.msra.gmra.mrb[4].mxu1 %vm276_vm1, %v730_v17  ;;  %v1100_v61 = vrot.slane %v1098_v50, 6  ;;  %v1101_v62 = vshll.u32 %v2837_v33, 16  ;;  %v1068_v0 = vsel %vm3603_vm8, %v1063_v51, %v1067_v47  ;;  %v1095_v4 = vrot.slane %v1093_v49, 7  ;;  %v3372_v50 = vld [vmem:[%s4011_s1 + $0xe8] sm:$0xff]  }
  0x38   : > { %3178 = vmatpush3.bf16.msra.mxu1 %v3358_v11  ;;  %3185 = vmatprep.mubr.msk.bf16.mxu1 %vm3458_vm0, %v3457_v1  ;;  %v1090_v2 = vor.u32 %v1089_v54, %v1086_v53  ;;  %v1107_v5 = vshll.u32 %v1054_v37, 16  ;;  %v3723_v9 = vsel %vm3603_vm8, %v1077_v60, %v1081_v52  ;;  %v2856_v11 = vld.sshfl [vmem:[%s3538_s9 + $0x40] sm:$0x13 pattern:$0x76325410]  ;;  %v1222_v13 = vcombine.high %v2855_v6, %v2855_v6 }
  0x39   : > { %3179 = vmatprep.subr.bf16.mxu1 %v3457_v1  ;;  %v1103_v10 = vrot.slane %v1101_v62, 7  ;;  %v1120_v19 = vcombine.low %v1068_v0, %v3723_v9  ;;  %v1230_v21 = vcombine.high %v2856_v11, %v2856_v11  ;;  %v2858_v24 = vld.sshfl [vmem:[%s3538_s9 + $0x48] sm:$0x13 pattern:$0x76325410]  ;;  %v1251_v27 = vshll.u32 %v2855_v6, 16 }
  0x3a   : > { %3172 = vmatpush3.bf16.msra.mxu0 %v3363_v14  ;;  %v1248_v14 = vshrl.u32 %v2855_v6, 16  ;;  %v1091_v15 = vrot.slane %v1090_v2, 2  ;;  %v1109_v17 = vrot.slane %v1107_v5, 7  ;;  %v1246_v32 = vcombine.high %v2858_v24, %v2858_v24  ;;  %v3377_v2 = vld [vmem:[%s4011_s1 + $0x100] sm:$0xff]  }
  0x3b   : > { %3189 = vmatprep.subr.bf16.mxu0 %v3457_v1  ;;  %v1128_v30 = vrot.slane %v1120_v19, %v3544_v16  ;;  %v1257_v33 = vshll.u32 %v1222_v13, 16  ;;  %v1253_v35 = vrot.slane %v1251_v27, 7  ;;  %v1262_v36 = vshrl.u32 %v2856_v11, 16 }
  0x3c   : > { %3180 = vmatpush3.bf16.msra.mxu1 %v3360_v20  ;;  %v2857_v20 = vld.sshfl [vmem:[%s3538_s9 + $0x44] sm:$0x13 pattern:$0x76325410]  ;;  %v1250_v26 = vrot.slane %v1248_v14, 6  ;;  %v3739_v29 = vsel %vm3603_vm8, %v1091_v15, %v1095_v4  ;;  %v1265_v37 = vshll.u32 %v2856_v11, 16 }
  0x3d   : > { %3174 = vmatmul.mubr.msk.bf16.vlgmr.msra.gmra.mrb[8].mxu0 %vm276_vm1, %v837_v22  ;;  %3181 = vmatprep.subr.bf16.mxu1 %v3457_v1  ;;  %v3370_v22 = vld [vmem:[%s4011_s1 + $0xe0] sm:$0xff]   ;;  %v1238_v25 = vcombine.high %v2857_v20, %v2857_v20  ;;  %v1259_v38 = vrot.slane %v1257_v33, 7  ;;  %v1271_v39 = vshll.u32 %v1230_v21, 16  ;;  %v1276_v40 = vshrl.u32 %v2857_v20, 16  ;;  %v3374_v11 = vld [vmem:[%s4011_s1 + $0xf0] sm:$0xff]   ;;  %v3379_v21 = vld [vmem:[%s4011_s1 + $0x108] sm:$0xff]  }
  0x3e   : > { %3190 = vmatpush3.bf16.msra.mxu0 %v3369_v23  ;;  %3197 = vmatprep.mubr.msk.bf16.mxu0 %vm3458_vm0, %v3457_v1  ;;  %v1104_v23 = vor.u32 %v1103_v10, %v1100_v61  ;;  %v1254_v43 = vor.u32 %v1253_v35, %v1250_v26  ;;  %v1264_v44 = vrot.slane %v1262_v36, 6  ;;  %v1267_v45 = vrot.slane %v1265_v37, 7  ;;  %v3426_v27 = vld.sshfl [vmem:[%s3538_s9 + $0xc] sm:$0xf pattern:$0x76325410] }
  0x3f   : > { %3191 = vmatprep.subr.bf16.mxu0 %v3457_v1  ;;  %v1273_v47 = vrot.slane %v1271_v39, 7  ;;  %v1278_v48 = vrot.slane %v1276_v40, 6  ;;  %v1285_v53 = vshll.u32 %v1238_v25, 16  ;;  %v1290_v54 = vshrl.u32 %v2858_v24, 16  ;;  %v3383_v36 = vld [vmem:[%s4011_s1 + $0x118] sm:$0xff]  }
  0x40   : > { %3182 = vmatpush3.bf16.msra.mxu1 %v3362_v41  ;;  %v1105_v34 = vrot.slane %v1104_v23, 2  ;;  %v1279_v41 = vshll.u32 %v2857_v20, 16  ;;  %v1255_v51 = vrot.slane %v1254_v43, 2  ;;  %v1268_v52 = vor.u32 %v1267_v45, %v1264_v44  ;;  %v3376_v23 = vld [vmem:[%s4011_s1 + $0xf8] sm:$0xff]   ;;  %v3380_v43 = vld [vmem:[%s4011_s1 + $0x128] sm:$0xff]  }
  0x41   : > { %3183 = vmatprep.subr.bf16.mxu1 %v3457_v1  ;;  %v1293_v60 = vshll.u32 %v2858_v24, 16  ;;  %v1299_v61 = vshll.u32 %v1246_v32, 16  ;;  %v1292_v0 = vrot.slane %v1290_v54, 6  ;;  %v2316_v14 = vcombine.low %v3723_v9, %v3739_v29  ;;  %v3381_v32 = vld [vmem:[%s4011_s1 + $0x110] sm:$0xff]   ;;  %v3400_v9 = vld [vmem:[%s4011_s1 + $0x1a8] sm:$0xff]  }
  0x42   : > { %3192 = vmatpush3.bf16.msra.mxu0 %v3371_v46  ;;  %v3746_v42 = vsel %vm3603_vm8, %v1105_v34, %v1109_v17  ;;  %v1281_v49 = vrot.slane %v1279_v41, 7  ;;  %v1269_v62 = vrot.slane %v1268_v52, 2  ;;  %v1260_v5 = vsel %vm3603_vm8, %v1255_v51, %v1259_v38  ;;  %v3425_v25 = vld.sshfl [vmem:[%s3538_s9 + $0x4] sm:$0xf pattern:$0x76325410] }
  0x43   : > { %3193 = vmatprep.subr.bf16.mxu0 %v3457_v1  ;;  %v1121_v46 = vcombine.low %v3739_v29, %v3746_v42  ;;  %v1295_v10 = vrot.slane %v1293_v60, 7  ;;  %v1301_v19 = vrot.slane %v1299_v61, 7  ;;  %v3378_v34 = vld [vmem:[%s4011_s1 + $0x120] sm:$0xff]   ;;  %v1435_v44 = vcombine.low %v3425_v25, %v3426_v27  ;;  %v3394_v25 = vld [vmem:[%s4011_s1 + $0x170] sm:$0xff]   ;;  %v3399_v27 = vld [vmem:[%s4011_s1 + $0x188] sm:$0xff]  }
  0x44   : > { %3184 = vmatpush3.bf16.msra.mxu1 %v3364_v55  ;;  %v3769_v13 = vsel %vm3603_vm8, %v1269_v62, %v1273_v47  ;;  %v2913_v37 = vld.sshfl [vmem:[%s3538_s9 + $0x10] sm:$0x13 pattern:$0x76325410] }
  0x45   : > { %3201 = vmatprep.subr.bf16.mxu1 %v3457_v1  ;;  %v1135_v55 = vrot.slane %v1121_v46, %v3544_v16  ;;  %v1296_v17 = vor.u32 %v1295_v10, %v1292_v0  ;;  %v1312_v20 = vcombine.low %v1260_v5, %v3769_v13  ;;  %v1652_v38 = vcombine.high %v2913_v37, %v2913_v37  ;;  %v2934_v41 = vld.sshfl [vmem:[%s3538_s9 + $0x24] sm:$0x13 pattern:$0x76325410]  ;;  %v3382_v62 = vld [vmem:[%s4011_s1 + $0x130] sm:$0xff]   ;;  %v3384_v5 = vld [vmem:[%s4011_s1 + $0x138] sm:$0xff]  }
  0x46   : > { %3194 = vmatpush3.bf16.msra.mxu0 %v3373_v63  ;;  %v1287_v63 = vrot.slane %v1285_v53, 7  ;;  %v1696_v39 = vshrl.u32 %v2913_v37, 16  ;;  %v1699_v40 = vshll.u32 %v2913_v37, 16  ;;  %v1844_v45 = vcombine.high %v2934_v41, %v2934_v41 }
  0x47   : > { %3195 = vmatprep.subr.bf16.mxu0 %v3457_v1  ;;  %3186 = vmatmul.mubr.msk.bf16.vlgmr.msra.gmra.mrb[8].mxu1 %vm276_vm1, %v944_v56  ;;  %v1282_v56 = vor.u32 %v1281_v49, %v1278_v48  ;;  %v1136_v4 = vcombine.low %v1128_v30, %v1135_v55  ;;  %v1297_v24 = vrot.slane %v1296_v17, 2  ;;  %v1320_v30 = vrot.slane %v1312_v20, %v3544_v16  ;;  %v3427_v48 = vld.sshfl [vmem:[%s3538_s9 + $0x18] sm:$0xf pattern:$0x76325410]  ;;  %v3393_v20 = vld [vmem:[%s4011_s1 + $0x150] sm:$0xff]  }
  0x48   : > { %3202 = vmatpush3.bf16.msra.mxu1 %v3370_v22  ;;  %3209 = vmatprep.mubr.msk.bf16.mxu1 %vm3458_vm0, %v3457_v1  ;;  %v1888_v46 = vshrl.u32 %v2934_v41, 16  ;;  %v1891_v47 = vshll.u32 %v2934_v41, 16  ;;  %v3428_v49 = vld.sshfl [vmem:[%s3538_s9 + $0x20] sm:$0xf pattern:$0x76325410]  ;;  %v1726_v17 = vrot.slane %v1718_v58, %v3544_v16 }
  0x49   : > { %3203 = vmatprep.subr.bf16.mxu1 %v3457_v1  ;;  %v1283_v6 = vrot.slane %v1282_v56, 2  ;;  %v3795_v26 = vsel %vm3603_vm8, %v1297_v24, %v1301_v19  ;;  %v1698_v51 = vrot.slane %v1696_v39, 6  ;;  %v1701_v52 = vrot.slane %v1699_v40, 7  ;;  %v3397_v24 = vld [vmem:[%s4011_s1 + $0x180] sm:$0xff]  }
  0x4a   : > { %3196 = vmatpush3.bf16.msra.mxu0 %v3375_v28  ;;  %v1705_v53 = vshll.u32 %v1652_v38, 16  ;;  %v1890_v54 = vrot.slane %v1888_v46, 6  ;;  %v1893_v55 = vrot.slane %v1891_v47, 7  ;;  %v1897_v56 = vshll.u32 %v1844_v45, 16 }
  0x4b   : > { %3213 = vmatprep.subr.bf16.mxu0 %v3457_v1  ;;  %v3777_v15 = vsel %vm3603_vm8, %v1283_v6, %v1287_v63  ;;  %v1702_v60 = vor.u32 %v1701_v52, %v1698_v51  ;;  %v1542_v18 = vcombine.low %v3427_v48, %v3428_v49  ;;  %v3429_v38 = vld.sshfl [vmem:[%s3538_s9 + $0x2c] sm:$0xf pattern:$0x76325410] }
  0x4c   : > { %3204 = vmatpush3.bf16.msra.mxu1 %v3372_v50  ;;  %v2508_v22 = vcombine.low %v3769_v13, %v3777_v15  ;;  %v1313_v28 = vcombine.low %v3777_v15, %v3795_v26  ;;  %v3389_v50 = vld [vmem:[%s4011_s1 + $0x140] sm:$0xff]   ;;  %v1707_v61 = vrot.slane %v1705_v53, 7  ;;  %v1894_v63 = vor.u32 %v1893_v55, %v1890_v54  ;;  %v3401_v48 = vld [vmem:[%s4011_s1 + $0x190] sm:$0xff]  }
  0x4d   : > { %3205 = vmatprep.subr.bf16.mxu1 %v3457_v1  ;;  %3198 = vmatmul.mubr.msk.bf16.vlgmr.msra.gmra.mrb[12].mxu0 %vm276_vm1, %v1136_v4  ;;  %v1899_v0 = vrot.slane %v1897_v56, 7  ;;  %v1703_v4 = vrot.slane %v1702_v60, 2  ;;  %v3398_v54 = vld [vmem:[%s4011_s1 + $0x1a0] sm:$0xff]   ;;  %v3403_v56 = vld [vmem:[%s4011_s1 + $0x198] sm:$0xff]  }
  0x4e   : > { %3214 = vmatpush3.bf16.msra.mxu0 %v3377_v2  ;;  %3221 = vmatprep.mubr.msk.bf16.mxu0 %vm3458_vm0, %v3457_v1  ;;  %v1327_v33 = vrot.slane %v1313_v28, %v3544_v16  ;;  %v3391_v2 = vld [vmem:[%s4011_s1 + $0x148] sm:$0xff]   ;;  %v1895_v6 = vrot.slane %v1894_v63, 2  ;;  %v2989_v28 = vld.sshfl [vmem:[%s3538_s9 + $0x38] sm:$0x13 pattern:$0x76325410] }
  0x4f   : > { %3215 = vmatprep.subr.bf16.mxu0 %v3457_v1  ;;  %v1708_v10 = vsel %vm3603_vm8, %v1703_v4, %v1707_v61  ;;  %v3431_v15 = vld.sshfl [vmem:[%s3538_s9 + $0x40] sm:$0xf pattern:$0x76325410]  ;;  %v3402_v4 = vld [vmem:[%s4011_s1 + $0x1b0] sm:$0xff]  }
  0x50   : > { %3206 = vmatpush3.bf16.msra.mxu1 %v3374_v11  ;;  %v1328_v35 = vcombine.low %v1320_v30, %v1327_v33  ;;  %v1719_v11 = vcombine.low %v3627_v31, %v1708_v10  ;;  %v1900_v19 = vsel %vm3603_vm8, %v1895_v6, %v1899_v0  ;;  %v3861_v31 = vrot.slane %v1910_v8, %v3544_v16  ;;  %v3392_v8 = vld [vmem:[%s4011_s1 + $0x168] sm:$0xff]   ;;  %v3413_v6 = vld [vmem:[%s4011_s1 + $0x1d0] sm:$0xff]  }
  0x51   : > { %3207 = vmatprep.subr.bf16.mxu1 %v3457_v1  ;;  %v2250_v30 = vcombine.high %v2989_v28, %v2989_v28  ;;  %v2297_v33 = vshll.u32 %v2989_v28, 16 }
  0x52   : > { %3216 = vmatpush3.bf16.msra.mxu0 %v3379_v21  ;;  %v1911_v21 = vcombine.low %v3662_v7, %v1900_v19  ;;  %v1733_v12 = vrot.slane %v1719_v11, %v3544_v16  ;;  %v3410_v11 = vld [vmem:[%s4011_s1 + $0x1e0] sm:$0xff]   ;;  %v3412_v19 = vld [vmem:[%s4011_s1 + $0x1e8] sm:$0xff]  }
  0x53   : > { %3217 = vmatprep.subr.bf16.mxu0 %v3457_v1  ;;  %v2299_v40 = vrot.slane %v2297_v33, 7  ;;  %v2303_v41 = vshll.u32 %v2250_v30, 16 }
  0x54   : > { %3208 = vmatpush3.bf16.msra.mxu1 %v3376_v23  ;;  %v3866_v58 = vrot.slane %v1911_v21, %v3544_v16  ;;  %v3390_v23 = vld [vmem:[%s4011_s1 + $0x160] sm:$0xff]   ;;  %v1734_v7 = vcombine.low %v1726_v17, %v1733_v12  ;;  %v3415_v17 = vld [vmem:[%s4011_s1 + $0x1d8] sm:$0xff]  }
  0x55   : > { %3225 = vmatprep.subr.bf16.mxu1 %v3457_v1  ;;  %v3416_v21 = vld [vmem:[%s4011_s1 + $0x1f8] sm:$0xff]  }
  0x56   : > { %3218 = vmatpush3.bf16.msra.mxu0 %v3381_v32  ;;  %v1926_v3 = vcombine.low %v3861_v31, %v3866_v58  ;;  %v2294_v32 = vshrl.u32 %v2989_v28, 16 }
  0x57   : > { %3219 = vmatprep.subr.bf16.mxu0 %v3457_v1  ;;  %3210 = vmatmul.mubr.msk.bf16.vlgmr.msra.gmra.mrb[12].mxu1 %vm276_vm1, %v1328_v35 }
  0x58   : > { %3226 = vmatpush3.bf16.msra.mxu1 %v3378_v34  ;;  %3233 = vmatprep.mubr.msk.bf16.mxu1 %vm3458_vm0, %v3457_v1  ;;  %v3010_v34 = vld.sshfl [vmem:[%s3538_s9 + $0x4c] sm:$0x13 pattern:$0x76325410]  ;;  %v2296_v39 = vrot.slane %v2294_v32, 6 }
  0x59   : > { %3227 = vmatprep.subr.bf16.mxu1 %v3457_v1  ;;  %v2442_v35 = vcombine.high %v3010_v34, %v3010_v34  ;;  %v2489_v37 = vshll.u32 %v3010_v34, 16 }
  0x5a   : > { %3220 = vmatpush3.bf16.msra.mxu0 %v3383_v36  ;;  %v2486_v36 = vshrl.u32 %v3010_v34, 16  ;;  %v2300_v49 = vor.u32 %v2299_v40, %v2296_v39 }
  0x5b   : > { %3237 = vmatprep.subr.bf16.mxu0 %v3457_v1  ;;  %v2491_v46 = vrot.slane %v2489_v37, 7  ;;  %v2495_v47 = vshll.u32 %v2442_v35, 16 }
  0x5c   : > { %3228 = vmatpush3.bf16.msra.mxu1 %v3380_v43  ;;  %v3396_v43 = vld [vmem:[%s4011_s1 + $0x178] sm:$0xff]   ;;  %v2488_v45 = vrot.slane %v2486_v36, 6  ;;  %v2301_v53 = vrot.slane %v2300_v49, 2 }
  0x5d   : > { %3222 = vmatmul.mubr.msk.bf16.vlgmr.msra.gmra.mrb[16].mxu0 %vm276_vm1, %v1435_v44  ;;  %3229 = vmatprep.subr.bf16.mxu1 %v3457_v1  ;;  %v3430_v44 = vld.sshfl [vmem:[%s3538_s9 + $0x34] sm:$0xf pattern:$0x76325410]  ;;  %v2497_v52 = vrot.slane %v2495_v47, 7 }
  0x5e   : > { %3238 = vmatpush3.bf16.msra.mxu0 %v3389_v50  ;;  %3245 = vmatprep.mubr.msk.bf16.mxu0 %vm3458_vm0, %v3457_v1  ;;  %v2305_v50 = vrot.slane %v2303_v41, 7  ;;  %v2492_v51 = vor.u32 %v2491_v46, %v2488_v45  ;;  %v2033_v57 = vcombine.low %v3429_v38, %v3430_v44 }
  0x5f   : > { %3239 = vmatprep.subr.bf16.mxu0 %v3457_v1 }
  0x60   : > { %3230 = vmatpush3.bf16.msra.mxu1 %v3382_v62  ;;  %v2493_v55 = vrot.slane %v2492_v51, 2  ;;  %v2306_v60 = vsel %vm3603_vm8, %v2301_v53, %v2305_v50  ;;  %v2324_v62 = vrot.slane %v2316_v14, %v3544_v16 }
  0x61   : > { %3231 = vmatprep.subr.bf16.mxu1 %v3457_v1  ;;  %v2317_v61 = vcombine.low %v3746_v42, %v2306_v60  ;;  %v3409_v42 = vld [vmem:[%s4011_s1 + $0x1c0] sm:$0xff]  }
  0x62   : > { %3240 = vmatpush3.bf16.msra.mxu0 %v3391_v2  ;;  %v2498_v63 = vsel %vm3603_vm8, %v2493_v55, %v2497_v52  ;;  %v2516_v2 = vrot.slane %v2508_v22, %v3544_v16  ;;  %v3432_v22 = vld.sshfl [vmem:[%s3538_s9 + $0x48] sm:$0xf pattern:$0x76325410] }
  0x63   : > { %3241 = vmatprep.subr.bf16.mxu0 %v3457_v1  ;;  %v2509_v0 = vcombine.low %v3795_v26, %v2498_v63  ;;  %v2331_v29 = vrot.slane %v2317_v61, %v3544_v16  ;;  %v2140_v10 = vcombine.low %v3431_v15, %v3432_v22 }
  0x64   : > { %3232 = vmatpush3.bf16.msra.mxu1 %v3384_v5  ;;  %v3404_v5 = vld [vmem:[%s4011_s1 + $0x1b8] sm:$0xff]  }
  0x65   : > { %3249 = vmatprep.subr.bf16.mxu1 %v3457_v1  ;;  %v2523_v13 = vrot.slane %v2509_v0, %v3544_v16  ;;  %v2332_v14 = vcombine.low %v2324_v62, %v2331_v29  ;;  %v3411_v16 = vld [vmem:[%s4011_s1 + $0x1c8] sm:$0xff]  }
  0x66   : > { %3242 = vmatpush3.bf16.msra.mxu0 %v3393_v20  ;;  %v3414_v20 = vld [vmem:[%s4011_s1 + $0x1f0] sm:$0xff]  }
  0x67   : > { %3243 = vmatprep.subr.bf16.mxu0 %v3457_v1  ;;  %3234 = vmatmul.mubr.msk.bf16.vlgmr.msra.gmra.mrb[16].mxu1 %vm276_vm1, %v1542_v18  ;;  %v2524_v26 = vcombine.low %v2516_v2, %v2523_v13 }
  0x68   : > { %3250 = vmatpush3.bf16.msra.mxu1 %v3390_v23  ;;  %3257 = vmatprep.mubr.msk.bf16.mxu1 %vm3458_vm0, %v3457_v1 }
  0x69   : > { %3251 = vmatprep.subr.bf16.mxu1 %v3457_v1 }
  0x6a   : > { %3244 = vmatpush3.bf16.msra.mxu0 %v3395_v59 }
  0x6b   : > { %3261 = vmatprep.subr.bf16.mxu0 %v3457_v1 }
  0x6c   : > { %3252 = vmatpush3.bf16.msra.mxu1 %v3392_v8 }
  0x6d   : > { %3246 = vmatmul.mubr.msk.bf16.vlgmr.msra.gmra.mrb[20].mxu0 %vm276_vm1, %v1734_v7  ;;  %3253 = vmatprep.subr.bf16.mxu1 %v3457_v1 }
  0x6e   : > { %3262 = vmatpush3.bf16.msra.mxu0 %v3397_v24  ;;  %3269 = vmatprep.mubr.msk.bf16.mxu0 %vm3458_vm0, %v3457_v1 }
  0x6f   : > { %3263 = vmatprep.subr.bf16.mxu0 %v3457_v1 }
  0x70   : > { %3254 = vmatpush3.bf16.msra.mxu1 %v3394_v25 }
  0x71   : > { %3255 = vmatprep.subr.bf16.mxu1 %v3457_v1 }
  0x72   : > { %3264 = vmatpush3.bf16.msra.mxu0 %v3399_v27 }
  0x73   : > { %3265 = vmatprep.subr.bf16.mxu0 %v3457_v1 }
  0x74   : > { %3256 = vmatpush3.bf16.msra.mxu1 %v3396_v43 }
  0x75   : > { %3273 = vmatprep.subr.bf16.mxu1 %v3457_v1 }
  0x76   : > { %3266 = vmatpush3.bf16.msra.mxu0 %v3401_v48 }
  0x77   : > { %3267 = vmatprep.subr.bf16.mxu0 %v3457_v1  ;;  %3258 = vmatmul.mubr.msk.bf16.vlgmr.msra.gmra.mrb[20].mxu1 %vm276_vm1, %v1926_v3 }
  0x78   : > { %3274 = vmatpush3.bf16.msra.mxu1 %v3398_v54  ;;  %3281 = vmatprep.mubr.msk.bf16.mxu1 %vm3458_vm0, %v3457_v1 }
  0x79   : > { %3275 = vmatprep.subr.bf16.mxu1 %v3457_v1 }
  0x7a   : > { %3268 = vmatpush3.bf16.msra.mxu0 %v3403_v56 }
  0x7b   : > { %3285 = vmatprep.subr.bf16.mxu0 %v3457_v1 }
  0x7c   : > { %3276 = vmatpush3.bf16.msra.mxu1 %v3400_v9 }
  0x7d   : > { %3270 = vmatmul.mubr.msk.bf16.vlgmr.msra.gmra.mrb[24].mxu0 %vm276_vm1, %v2033_v57  ;;  %3277 = vmatprep.subr.bf16.mxu1 %v3457_v1 }
  0x7e   : > { %3286 = vmatpush3.bf16.msra.mxu0 %v3409_v42  ;;  %3293 = vmatprep.mubr.msk.bf16.mxu0 %vm3458_vm0, %v3457_v1 }
  0x7f   : > { %3287 = vmatprep.subr.bf16.mxu0 %v3457_v1 }
  0x80   : > { %3278 = vmatpush3.bf16.msra.mxu1 %v3402_v4 }
  0x81   : > { %3279 = vmatprep.subr.bf16.mxu1 %v3457_v1 }
  0x82   : > { %3288 = vmatpush3.bf16.msra.mxu0 %v3411_v16 }
  0x83   : > { %3289 = vmatprep.subr.bf16.mxu0 %v3457_v1 }
  0x84   : > { %3280 = vmatpush3.bf16.msra.mxu1 %v3404_v5 }
  0x85   : > { %3297 = vmatprep.subr.bf16.mxu1 %v3457_v1 }
  0x86   : > { %3290 = vmatpush3.bf16.msra.mxu0 %v3413_v6 }
  0x87   : > { %3291 = vmatprep.subr.bf16.mxu0 %v3457_v1  ;;  %3282 = vmatmul.mubr.msk.bf16.vlgmr.msra.gmra.mrb[24].mxu1 %vm276_vm1, %v2140_v10 }
  0x88   : > { %3298 = vmatpush3.bf16.msra.mxu1 %v3410_v11  ;;  %3305 = vmatprep.mubr.msk.bf16.mxu1 %vm3458_vm0, %v3457_v1 }
  0x89   : > { %3299 = vmatprep.subr.bf16.mxu1 %v3457_v1 }
  0x8a   : > { %3292 = vmatpush3.bf16.msra.mxu0 %v3415_v17 }
  0x8c   : > { %3300 = vmatpush3.bf16.msra.mxu1 %v3412_v19 }
  0x8d   : > { %3294 = vmatmul.mubr.msk.bf16.vlgmr.msra.gmra.mrb[28].mxu0 %vm276_vm1, %v2332_v14  ;;  %3301 = vmatprep.subr.bf16.mxu1 %v3457_v1 }
  0x90   : > { %3302 = vmatpush3.bf16.msra.mxu1 %v3414_v20 }
  0x91   : > { %3303 = vmatprep.subr.bf16.mxu1 %v3457_v1 }
  0x94   : > { %3304 = vmatpush3.bf16.msra.mxu1 %v3416_v21 }
  0x97   : > { %3306 = vmatmul.mubr.msk.bf16.vlgmr.msra.gmra.mrb[28].mxu1 %vm276_vm1, %v2524_v26 }
  0xea   : > { %v314_v31 = vpop.f32.mrb[0].mxu0 }
  0xeb   : > { %v403_v12 = vpop.f32.mrb[0].mxu1  ;;  %v3127_v58 = vpop.f32.mrb[1].mxu0 }
  0xec   : > { %v404_v18 = vadd.f32 %v403_v12, %v314_v31  ;;  %v3139_v23 = vpop.f32.mrb[1].mxu1  ;;  %v317_v7 = vpop.f32.mrb[2].mxu0 }
  0xed   : > { %v406_v59 = vpop.f32.mrb[2].mxu1  ;;  %v3128_v8 = vpop.f32.mrb[3].mxu0 }
  0xee   : > { %v407_v3 = vadd.f32 %v406_v59, %v317_v7  ;;  %v3140_v24 = vpop.f32.mrb[3].mxu1 }
 0x100   : > { %v600_v25 = vpop.f32.mrb[4].mxu0 }
 0x101   : > { %v607_v27 = vadd.f32 %v600_v25, %v404_v18  ;;  %v3151_v28 = vpop.f32.mrb[5].mxu0 }
 0x102   : > { %v603_v30 = vpop.f32.mrb[6].mxu0 }
 0x103   : > { %v608_v32 = vadd.f32 %v603_v30, %v407_v3  ;;  %v3152_v33 = vpop.f32.mrb[7].mxu0 }
 0x10a   : > { %v792_v1 = vpop.f32.mrb[4].mxu1 }
 0x10b   : > { %v799_v34 = vadd.f32 %v792_v1, %v607_v27  ;;  %v3163_v35 = vpop.f32.mrb[5].mxu1 }
 0x10c   : > { %v795_v36 = vpop.f32.mrb[6].mxu1 }
 0x10d   : > { %v800_v37 = vadd.f32 %v795_v36, %v608_v32  ;;  %v3164_v38 = vpop.f32.mrb[7].mxu1 }
 0x110   : > { %v899_v39 = vpop.f32.mrb[8].mxu0 }
 0x111   : > { %v906_v40 = vadd.f32 %v899_v39, %v799_v34  ;;  %v3175_v41 = vpop.f32.mrb[9].mxu0 }
 0x112   : > { %v902_v43 = vpop.f32.mrb[10].mxu0 }
 0x113   : > { %v907_v44 = vadd.f32 %v902_v43, %v800_v37  ;;  %v3176_v45 = vpop.f32.mrb[11].mxu0  ;;  %v3024_v43 = vld [vmem:[%s4012_s2] ss:$0 sm:$0xff] }
 0x11a   : > { %v1006_v46 = vpop.f32.mrb[8].mxu1 }
 0x11b   : > { %v1013_v47 = vadd.f32 %v1006_v46, %v906_v40  ;;  %v3187_v48 = vpop.f32.mrb[9].mxu1 }
 0x11c   : > { %v1009_v49 = vpop.f32.mrb[10].mxu1 }
 0x11d   : > { %v1014_v50 = vadd.f32 %v1009_v49, %v907_v44  ;;  %v3188_v51 = vpop.f32.mrb[11].mxu1 }
 0x120   : > { %v1198_v52 = vpop.f32.mrb[12].mxu0 }
 0x121   : > { %v1205_v53 = vadd.f32 %v1198_v52, %v1013_v47  ;;  %v3199_v54 = vpop.f32.mrb[13].mxu0 }
 0x122   : > { %v1201_v55 = vpop.f32.mrb[14].mxu0 }
 0x123   : > { %v1206_v56 = vadd.f32 %v1201_v55, %v1014_v50  ;;  %v3200_v60 = vpop.f32.mrb[15].mxu0 }
 0x12a   : > { %v1390_v61 = vpop.f32.mrb[12].mxu1 }
 0x12b   : > { %v1397_v62 = vadd.f32 %v1390_v61, %v1205_v53  ;;  %v3211_v63 = vpop.f32.mrb[13].mxu1 }
 0x12c   : > { %v1393_v0 = vpop.f32.mrb[14].mxu1 }
 0x12d   : > { %v1398_v2 = vadd.f32 %v1393_v0, %v1206_v56  ;;  %v3212_v9 = vpop.f32.mrb[15].mxu1 }
 0x130   : > { %v1497_v57 = vpop.f32.mrb[16].mxu0 }
 0x131   : > { %v1504_v29 = vadd.f32 %v1497_v57, %v1397_v62  ;;  %v3223_v42 = vpop.f32.mrb[17].mxu0 }
 0x132   : > { %v1500_v13 = vpop.f32.mrb[18].mxu0 }
 0x133   : > { %v1505_v14 = vadd.f32 %v1500_v13, %v1398_v2  ;;  %v3224_v15 = vpop.f32.mrb[19].mxu0 }
 0x13a   : > { %v1604_v22 = vpop.f32.mrb[16].mxu1 }
 0x13b   : > { %v1611_v26 = vadd.f32 %v1604_v22, %v1504_v29  ;;  %v3235_v4 = vpop.f32.mrb[17].mxu1 }
 0x13c   : > { %v1607_v16 = vpop.f32.mrb[18].mxu1 }
 0x13d   : > { %v1612_v5 = vadd.f32 %v1607_v16, %v1505_v14  ;;  %v3236_v6 = vpop.f32.mrb[19].mxu1 }
 0x140   : > { %v1796_v10 = vpop.f32.mrb[20].mxu0 }
 0x141   : > { %v1803_v11 = vadd.f32 %v1796_v10, %v1611_v26  ;;  %v3247_v17 = vpop.f32.mrb[21].mxu0 }
 0x142   : > { %v1799_v19 = vpop.f32.mrb[22].mxu0 }
 0x143   : > { %v1804_v20 = vadd.f32 %v1799_v19, %v1612_v5  ;;  %v3248_v21 = vpop.f32.mrb[23].mxu0 }
 0x14a   : > { %v1988_v31 = vpop.f32.mrb[20].mxu1 }
 0x14b   : > { %v1995_v12 = vadd.f32 %v1988_v31, %v1803_v11  ;;  %v3259_v18 = vpop.f32.mrb[21].mxu1 }
 0x14c   : > { %v1991_v58 = vpop.f32.mrb[22].mxu1 }
 0x14d   : > { %v1996_v23 = vadd.f32 %v1991_v58, %v1804_v20  ;;  %v3260_v7 = vpop.f32.mrb[23].mxu1 }
 0x150   : > { %v2095_v59 = vpop.f32.mrb[24].mxu0 }
 0x151   : > { %v2102_v3 = vadd.f32 %v2095_v59, %v1995_v12  ;;  %v3271_v8 = vpop.f32.mrb[25].mxu0 }
 0x152   : > { %v2098_v24 = vpop.f32.mrb[26].mxu0 }
 0x153   : > { %v2103_v25 = vadd.f32 %v2098_v24, %v1996_v23  ;;  %v3272_v27 = vpop.f32.mrb[27].mxu0 }
 0x15a   : > { %v2202_v28 = vpop.f32.mrb[24].mxu1 }
 0x15b   : > { %v2209_v30 = vadd.f32 %v2202_v28, %v2102_v3  ;;  %v3283_v32 = vpop.f32.mrb[25].mxu1 }
 0x15c   : > { %v2205_v33 = vpop.f32.mrb[26].mxu1 }
 0x15d   : > { %v2210_v1 = vadd.f32 %v2205_v33, %v2103_v25  ;;  %v3284_v34 = vpop.f32.mrb[27].mxu1 }
 0x160   : > { %v2394_v35 = vpop.f32.mrb[28].mxu0 }
 0x161   : > { %v2401_v36 = vadd.f32 %v2394_v35, %v2209_v30  ;;  %v3295_v37 = vpop.f32.mrb[29].mxu0 }
 0x162   : > { %v2397_v38 = vpop.f32.mrb[30].mxu0 }
 0x163   : > { %v2402_v39 = vadd.f32 %v2397_v38, %v2210_v1  ;;  %v3296_v40 = vpop.f32.mrb[31].mxu0 }
 0x16a   : > { %v2586_v41 = vpop.f32.mrb[28].mxu1 }
 0x16b   : > { %v2593_v44 = vadd.f32 %v2586_v41, %v2401_v36  ;;  %v3307_v45 = vpop.f32.mrb[29].mxu1 }
 0x16c   : > { %v2589_v46 = vpop.f32.mrb[30].mxu1 }
 0x16d   : > { %v2602_v47 = vadd.f32 %v3024_v43, %v2593_v44  ;;  %v2594_v48 = vadd.f32 %v2589_v46, %v2402_v39  ;;  %v3308_v49 = vpop.f32.mrb[31].mxu1 }
 0x16f   : > { %v2603_v50 = vadd.f32 %v3024_v43, %v2594_v48  ;;  %v2604_v51 = vmax.f32 %v2602_v47, 0.0 }
 0x171   : > { %v2605_v52 = vmax.f32 %v2603_v50, 0.0 }
 0x173   : > { %v3035_v53 = vpack.c.bf16 %v2605_v52, %v2604_v51 }
 0x175   : > { %3036 = vst [vmem:[%s197_s20] sm:$0xff] %v3035_v53  }
 0x176 PF: > { %s13_s14 = sadd.s32 1, %s3455_s14   ;;  %s4020_s12 = smov %s3451_s13 }
 0x177   : > { %p10_p6 = scmp.ge.s32.totalorder %s13_s14, 4   ;;  %s4021_s13 = smov %s4023_s15 }
 0x179   :  { %12 = sbr.rel (!%p10_p6) target bundleno = 2 (0x2), region = 85 }

// kernel: encoder_forward.5
= control target key start
LH: loop header
LB: loop body
LE: loop exit
PB: predicated region body
PF: predicated region fallthrough
CT: control target
= control target key end

     0   :  { %8 = vsyncpa [#allocation3], 0  ;;  %s3274_s0 = inlined_call_operand.vmem [shape: bf16[2,6,6,128], index: 0, kind: input, shape index: {}]   ;;  %s3275_s1 = inlined_call_operand.vmem [shape: bf16[9,128,128], index: 1, kind: input, shape index: {}]   ;;  %s3276_s2 = inlined_call_operand.vmem [shape: f32[1,128], index: 2, kind: input, shape index: {}]   ;;  %s3277_s3 = inlined_call_operand.hbm [shape: f32[2,16,128], index: 3, kind: output, shape index: {}]  }
   0x1   :  { %10 = vsyncpa [#allocation3 + $0x1], 0  ;;  %s2713_s12 = smov 0   ;;  %s2715_s13 = smov 0  }
   0x2   :  { %s2717_s14 = smov 0   ;;  %s2719_s15 = smov 0  }
   0x3   :  { %s2721_s16 = smov 0   ;;  %s2723_s17 = smov 0  }
   0x4 LB: > { %s1927_s18 = sadd.s32 4294967295, %s2685_s17   ;;  %s1928_s19 = sadd.s32 4294967294, %s2685_s17   ;;  %s2685_s17 = sphi %s2723_s17, %s16_s17   ;;  %s2681_s16 = sphi %s2721_s16, %s3292_s16   ;;  %s2677_s15 = sphi %s2719_s15, %s3291_s15   ;;  %s2673_s14 = sphi %s2717_s14, %s3290_s14   ;;  %s2669_s13 = sphi %s2715_s13, %s3289_s13   ;;  %s2665_s12 = sphi %s2713_s12, %s3288_s12  }
   0x5   : > { %s28_s20 = sadd.s32 1, %s2681_s16  ;;  %s105_s21 = sadd.s32 1, %s2673_s14 }
   0x6   : > { %p30_p0 = scmp.ge.s32.totalorder %s28_s20, 2  ;;  %p115_p1 = scmp.ne.s32.totalorder %s2673_s14, %s2669_s13 }
   0x7   : > { %p116_p2 = scmp.eq.s32.totalorder %s1927_s18, 1  ;;  %p121_p3 = scmp.ne.s32.totalorder %s2669_s13, %s2665_s12 }
   0x8   : > { %s3294_s20 = smov (%p30_p0, %s28_s20), 0  ;;  %p122_p5 = scmp.eq.s32.totalorder %s1928_s19, 1 }
   0x9   : > { %p2753_p4 = por %p116_p2, %p115_p1  ;;  %s100_s23 = ssub.s32 %s2681_s16, %s3294_s20 }
   0xa   : > { %p1931_p6 = scmp.ge.s32.totalorder %s2685_s17, 1  ;;  %p103_p7 = scmp.eq.s32.totalorder %s100_s23, 0 }
   0xb   : > { %p2760_p8 = por %p122_p5, %p121_p3  ;;  %p154_p9 = scmp.lt.s32.totalorder %s2685_s17, 3 }
   0xc   : > { %s2766_s25 = scalar_select %p103_p7, %s2673_s14, %s105_s21  }
   0xd   : > { %p155_p10 = pnand %p1931_p6, %p154_p9 }
   0xe   : > { %v2523_v0 = vld [vmem:[%s3275_s1 + $0x40] sm:$0xff] (!%p155_p10)   ;;  %v2687_v1 = vmov (!%p155_p10), 0.0   ;;  %v2525_v3 = vld [vmem:[%s3275_s1 + $0x48] sm:$0xff] (!%p155_p10)   ;;  %vm2688_vm0 = vmmov (!%p155_p10), 0   ;;  %p178_p11 = scmp.lt.s32.totalorder (!%p155_p10), %s2677_s15, 1  ;;  %v2527_v5 = vld [vmem:[%s3275_s1 + $0x50] sm:$0xff] (!%p155_p10)   ;;  %v333_v9 = vlaneseq (!%p155_p10) }
   0xf   : > { %158 = sbr.rel (%p155_p10) target bundleno = 411 (0x19b), region = 32  ;;  %2282 = vmatprep.subr.bf16.mxu0 (!%p155_p10), %v2687_v1  ;;  %2302 = vmatprep.subr.bf16.mxu1 (!%p155_p10), %v2687_v1  ;;  %v2524_v2 = vld [vmem:[%s3275_s1] sm:$0xff] (!%p155_p10)   ;;  %v2526_v4 = vld [vmem:[%s3275_s1 + $0x8] sm:$0xff] (!%p155_p10)   ;;  %v2528_v6 = vld [vmem:[%s3275_s1 + $0x10] sm:$0xff] (!%p155_p10)   ;;  %vm248_vm1 = vsmask.f32 (!%p155_p10), 1280 }
  0x10   : > { %2283 = vmatpush3.bf16.msra.mxu0 (!%p155_p10), %v2523_v0  ;;  %2298 = vmatprep.mubr.msk.bf16.mxu0 (!%p155_p10), %vm2688_vm0, %v2687_v1  ;;  %v2529_v7 = vld [vmem:[%s3275_s1 + $0x58] sm:$0xff] (!%p155_p10)   ;;  %v2531_v10 = vld [vmem:[%s3275_s1 + $0x60] sm:$0xff] (!%p155_p10)   ;;  %v2818_v12 = vshrl.u32 (!%p155_p10), %v333_v9, 7  ;;  %v2533_v13 = vld [vmem:[%s3275_s1 + $0x68] sm:$0xff] (!%p155_p10)   ;;  %vm249_vm2 = vsmask.f32 (!%p155_p10), 3336 }
  0x11   : > { %2303 = vmatpush3.bf16.msra.mxu1 (!%p155_p10), %v2524_v2  ;;  %2284 = vmatprep.subr.bf16.mxu0 (!%p155_p10), %v2687_v1  ;;  %v2530_v8 = vld [vmem:[%s3275_s1 + $0x18] sm:$0xff] (!%p155_p10)   ;;  %v2532_v11 = vld [vmem:[%s3275_s1 + $0x20] sm:$0xff] (!%p155_p10)   ;;  %v2534_v15 = vld [vmem:[%s3275_s1 + $0x28] sm:$0xff] (!%p155_p10)   ;;  %vm251_vm3 = vsmask.f32 (!%p155_p10), 5392  ;;  %vm586_vm8 = vcmask (!%p155_p10), 1040384  }
  0x12   : > { %2304 = vmatprep.subr.bf16.mxu1 (!%p155_p10), %v2687_v1  ;;  %2318 = vmatprep.mubr.msk.bf16.mxu1 (!%p155_p10), %vm2688_vm0, %v2687_v1  ;;  %vm250_vm4 = vmor (!%p155_p10), %vm248_vm1, %vm249_vm2  ;;  %vm253_vm5 = vsmask.f32 (!%p155_p10), 7448  ;;  %v2535_v22 = vld [vmem:[%s3275_s1 + $0x70] sm:$0xff] (!%p155_p10)   ;;  %v2537_v45 = vld [vmem:[%s3275_s1 + $0x78] sm:$0xff] (!%p155_p10)   ;;  %v2689_v57 = vmov (!%p155_p10), 1983009808  }
  0x13   : > { %v2536_v27 = vld [vmem:[%s3275_s1 + $0x30] sm:$0xff] (!%p155_p10)   ;;  %vm2840_vm6 = vmor (!%p155_p10), %vm250_vm4, %vm251_vm3  ;;  %v2538_v50 = vld [vmem:[%s3275_s1 + $0x38] sm:$0xff] (!%p155_p10)   ;;  %v331_v58 = vunpack.c.l.s4 (!%p155_p10), %v2689_v57  ;;  %vm587_vm9 = vcmask (!%p155_p10), 1042434   ;;  %vm589_vm11 = vcmask (!%p155_p10), 1044484   ;;  %vm591_vm12 = vcmask (!%p155_p10), 1046534   ;;  %s175_s28 = sand.u32 (!%p155_p10), 1, %s2669_s13  }
  0x14   : > { %2285 = vmatpush3.bf16.msra.mxu0 (!%p155_p10), %v2525_v3  ;;  %vm2852_vm7 = vmor (!%p155_p10), %vm2840_vm6, %vm253_vm5  ;;  %s3228_s11 = scalar_lea.sflag (!%p155_p10), [#allocation3], %s175_s28 }
  0x15   : > { %2305 = vmatpush3.bf16.msra.mxu1 (!%p155_p10), %v2526_v4  ;;  %2286 = vmatprep.subr.bf16.mxu0 (!%p155_p10), %v2687_v1  ;;  %v332_v3 = vunpack.c.0.s8 (!%p155_p10), %v331_v58  ;;  %vm2922_vm10 = vmor (!%p155_p10), %vm586_vm8, %vm587_vm9 }
  0x16   : > { %s179_s7 = scalar_select %p178_p11, %s2677_s15, 1  ;;  %2306 = vmatprep.subr.bf16.mxu1 %v2687_v1  ;;  %vm590_vm13 = vmor %vm2922_vm10, %vm589_vm11 }
  0x17   : > { %vm2945_vm14 = vmor %vm590_vm13, %vm591_vm12 }
  0x18   : > { %s2462_s18 = smul.u32 24, %s179_s7  ;;  %2287 = vmatpush3.bf16.msra.mxu0 %v2527_v5  ;;  %s2200_s7 = sshll.u32 %s2677_s15, 8 }
  0x19   : > { %2307 = vmatpush3.bf16.msra.mxu1 %v2528_v6  ;;  %2288 = vmatprep.subr.bf16.mxu0 %v2687_v1  ;;  %s3226_s10 = scalar_lea.hbm %s3277_s3, %s2200_s7 }
  0x1a   : > { %2308 = vmatprep.subr.bf16.mxu1 %v2687_v1  ;;  %s2809_s29 = scalar_lea.vmem %s3274_s0, %s2462_s18  ;;  %s2690_s18 = smov [#allocation2]  }
  0x1b   : > { %v1934_v14 = vld.sshfl [vmem:[%s2809_s29] sm:$0x13 pattern:$0x76325410]  ;;  %s2611_s19 = sshll.u32 %s2690_s18, 4  ;;  %s2612_s19 = int_to_ptr.vmem [resolvable:$false] %s2611_s19 }
  0x1c   : > { %2289 = vmatpush3.bf16.msra.mxu0 %v2529_v7  ;;  %v1935_v16 = vld.sshfl [vmem:[%s2809_s29 + $0x4] sm:$0x13 pattern:$0x76325410]  ;;  %v223_v17 = vcombine.high %v1934_v14, %v1934_v14  ;;  %v256_v24 = vshrl.u32 %v1934_v14, 16  ;;  %v259_v25 = vshll.u32 %v1934_v14, 16  ;;  %v2875_v7 = vsub.s32 %v332_v3, %v2818_v12 }
  0x1d   : > { %2309 = vmatpush3.bf16.msra.mxu1 %v2530_v8  ;;  %2290 = vmatprep.subr.bf16.mxu0 %v2687_v1  ;;  %v1936_v18 = vld.sshfl [vmem:[%s2809_s29 + $0x8] sm:$0x13 pattern:$0x76325410]  ;;  %v231_v19 = vcombine.high %v1935_v16, %v1935_v16  ;;  %v270_v28 = vshrl.u32 %v1935_v16, 16  ;;  %v273_v29 = vshll.u32 %v1935_v16, 16 }
  0x1e   : > { %2310 = vmatprep.subr.bf16.mxu1 %v2687_v1  ;;  %v1937_v20 = vld.sshfl [vmem:[%s2809_s29 + $0xc] sm:$0x13 pattern:$0x76325410]  ;;  %v239_v21 = vcombine.high %v1936_v18, %v1936_v18  ;;  %v265_v26 = vshll.u32 %v223_v17, 16  ;;  %v284_v31 = vshrl.u32 %v1936_v18, 16 }
  0x1f   : > { %v247_v23 = vcombine.high %v1937_v20, %v1937_v20  ;;  %v279_v30 = vshll.u32 %v231_v19, 16  ;;  %v258_v33 = vrot.slane %v256_v24, 6  ;;  %v261_v34 = vrot.slane %v259_v25, 7  ;;  %v2542_v12 = vld [vmem:[%s3275_s1 + $0xc0] sm:$0xff]   ;;  %v2544_v17 = vld [vmem:[%s3275_s1 + $0xc8] sm:$0xff]   ;;  %v2546_v19 = vld [vmem:[%s3275_s1 + $0xd0] sm:$0xff]  }
  0x20   : > { %2291 = vmatpush3.bf16.msra.mxu0 %v2531_v10  ;;  %v267_v35 = vrot.slane %v265_v26, 7  ;;  %v287_v36 = vshll.u32 %v1936_v18, 16  ;;  %v272_v37 = vrot.slane %v270_v28, 6  ;;  %v275_v38 = vrot.slane %v273_v29, 7  ;;  %v2543_v18 = vld [vmem:[%s3275_s1 + $0x88] sm:$0xff]   ;;  %v2547_v28 = vld [vmem:[%s3275_s1 + $0x98] sm:$0xff]  }
  0x21   : > { %2311 = vmatpush3.bf16.msra.mxu1 %v2532_v11  ;;  %2292 = vmatprep.subr.bf16.mxu0 %v2687_v1  ;;  %v281_v39 = vrot.slane %v279_v30, 7  ;;  %v286_v40 = vrot.slane %v284_v31, 6  ;;  %v262_v41 = vor.u32 %v261_v34, %v258_v33  ;;  %v293_v43 = vshll.u32 %v239_v21, 16  ;;  %v2550_v29 = vld [vmem:[%s3275_s1 + $0xe0] sm:$0xff]   ;;  %s2613_s21 = scalar_lea.vmem %s2612_s19, 512 }
  0x22   : > { %2312 = vmatprep.subr.bf16.mxu1 %v2687_v1  ;;  %v289_v42 = vrot.slane %v287_v36, 7  ;;  %v298_v44 = vshrl.u32 %v1937_v20, 16  ;;  %v276_v47 = vor.u32 %v275_v38, %v272_v37  ;;  %v301_v48 = vshll.u32 %v1937_v20, 16  ;;  %v2549_v37 = vld [vmem:[%s3275_s1 + $0xa0] sm:$0xff]  }
  0x23   : > { %v307_v49 = vshll.u32 %v247_v23, 16  ;;  %v263_v51 = vrot.slane %v262_v41, 2  ;;  %v295_v53 = vrot.slane %v293_v43, 7  ;;  %v2545_v23 = vld [vmem:[%s3275_s1 + $0x90] sm:$0xff]   ;;  %v2552_v43 = vld [vmem:[%s3275_s1 + $0xe8] sm:$0xff]   ;;  %v2560_v3 = vld [vmem:[%s3275_s1 + $0x140] sm:$0xff]  }
  0x24   : > { %2293 = vmatpush3.bf16.msra.mxu0 %v2533_v13  ;;  %v290_v52 = vor.u32 %v289_v42, %v286_v40  ;;  %v300_v54 = vrot.slane %v298_v44, 6  ;;  %v277_v55 = vrot.slane %v276_v47, 2  ;;  %v303_v56 = vrot.slane %v301_v48, 7  ;;  %v2551_v44 = vld [vmem:[%s3275_s1 + $0xa8] sm:$0xff]   ;;  %v2568_v26 = vld [vmem:[%s3275_s1 + $0x160] sm:$0xff]  }
  0x25   : > { %2313 = vmatpush3.bf16.msra.mxu1 %v2534_v15  ;;  %2294 = vmatprep.subr.bf16.mxu0 %v2687_v1  ;;  %v2601_v59 = vld.sshfl [vmem:[%s2809_s29] sm:$0xf pattern:$0x76325410]  ;;  %v268_v61 = vsel %vm2852_vm7, %v263_v51, %v267_v35  ;;  %v309_v63 = vrot.slane %v307_v49, 7 }
  0x26   : > { %2314 = vmatprep.subr.bf16.mxu1 %v2687_v1  ;;  %v2602_v60 = vld.sshfl [vmem:[%s2809_s29 + $0x8] sm:$0xf pattern:$0x76325410]  ;;  %v291_v62 = vrot.slane %v290_v52, 2  ;;  %v2867_v0 = vsel %vm2852_vm7, %v277_v55, %v281_v39  ;;  %v304_v2 = vor.u32 %v303_v56, %v300_v54  ;;  %v2541_v15 = vld [vmem:[%s3275_s1 + $0x80] sm:$0xff]  }
  0x27   : > { %v328_v5 = vcombine.low %v268_v61, %v2867_v0  ;;  %v455_v13 = vcombine.low %v2601_v59, %v2602_v60  ;;  %v1970_v20 = vld.sshfl [vmem:[%s2809_s29] sm:$0x12 pattern:$0x76325410]  ;;  %v2554_v52 = vld [vmem:[%s3275_s1 + $0xf0] sm:$0xff]   ;;  %v2556_v56 = vld [vmem:[%s3275_s1 + $0xf8] sm:$0xff]  }
  0x28   : > { %2295 = vmatpush3.bf16.msra.mxu0 %v2535_v22  ;;  %v2871_v4 = vsel %vm2852_vm7, %v291_v62, %v295_v53  ;;  %v305_v6 = vrot.slane %v304_v2, 2  ;;  %v1971_v21 = vld.sshfl [vmem:[%s2809_s29 + $0x4] sm:$0x12 pattern:$0x76325410]  ;;  %v561_v25 = vcombine.high %v1970_v20, %v1970_v20  ;;  %v1974_v31 = vrot.slane %v1970_v20, 9 }
  0x29   : > { %2315 = vmatpush3.bf16.msra.mxu1 %v2536_v27  ;;  %2296 = vmatprep.subr.bf16.mxu0 %v2687_v1  ;;  %v985_v8 = vcombine.low %v2867_v0, %v2871_v4  ;;  %v336_v11 = vrot.slane %v328_v5, %v2875_v7  ;;  %v1972_v22 = vld.sshfl [vmem:[%s2809_s29 + $0x8] sm:$0x12 pattern:$0x76325410]  ;;  %v2548_v27 = vld [vmem:[%s3275_s1 + $0xd8] sm:$0xff]   ;;  %v569_v30 = vcombine.high %v1971_v21, %v1971_v21  ;;  %v1975_v32 = vrot.slane %v1971_v21, 9 }
  0x2a   : > { %2316 = vmatprep.subr.bf16.mxu1 %v2687_v1  ;;  %v2883_v9 = vsel %vm2852_vm7, %v305_v6, %v309_v63  ;;  %v1973_v24 = vld.sshfl [vmem:[%s2809_s29 + $0xc] sm:$0x12 pattern:$0x76325410]  ;;  %v577_v33 = vcombine.high %v1972_v22, %v1972_v22  ;;  %v595_v35 = vrot.slane %v561_v25, 7  ;;  %v1976_v36 = vrot.slane %v1972_v22, 9 }
  0x2b   : > { %v329_v10 = vcombine.low %v2871_v4, %v2883_v9  ;;  %v585_v34 = vcombine.high %v1973_v24, %v1973_v24  ;;  %v599_v38 = vrot.slane %v569_v30, 7  ;;  %v1977_v39 = vrot.slane %v1973_v24, 9  ;;  %v2603_v48 = vld.sshfl [vmem:[%s2809_s29 + $0x4] sm:$0xf pattern:$0x76325410] }
  0x2c   : > { %2297 = vmatpush3.bf16.msra.mxu0 %v2537_v45  ;;  %v603_v41 = vrot.slane %v577_v33, 7  ;;  %v596_v45 = vsel %vm2945_vm14, %v1974_v31, %v595_v35  ;;  %v2604_v51 = vld.sshfl [vmem:[%s2809_s29 + $0xc] sm:$0xf pattern:$0x76325410]  ;;  %v2555_v63 = vld [vmem:[%s3275_s1 + $0xb8] sm:$0xff]   ;;  %v3028_v21 = vrot.slane %v985_v8, %v2875_v7 }
  0x2d   : > { %2317 = vmatpush3.bf16.msra.mxu1 %v2538_v50  ;;  %2322 = vmatprep.subr.bf16.mxu0 %v2687_v1  ;;  %v2892_v14 = vrot.slane %v329_v10, %v2875_v7  ;;  %v607_v42 = vrot.slane %v585_v34, 7  ;;  %v2961_v47 = vsel %vm2945_vm14, %v1975_v32, %v599_v38  ;;  %v2553_v55 = vld [vmem:[%s3275_s1 + $0xb0] sm:$0xff]   ;;  %v779_v2 = vcombine.low %v2603_v48, %v2604_v51  ;;  %v2566_v8 = vld [vmem:[%s3275_s1 + $0x158] sm:$0xff]   ;;  %v2570_v30 = vld [vmem:[%s3275_s1 + $0x168] sm:$0xff]  }
  0x2e   : > { %2342 = vmatprep.subr.bf16.mxu1 %v2687_v1  ;;  %v2966_v49 = vsel %vm2945_vm14, %v1976_v36, %v603_v41  ;;  %v626_v53 = vcombine.low %v596_v45, %v2961_v47  ;;  %v2037_v58 = vld.sshfl [vmem:[%s2809_s29 + $0x10] sm:$0x13 pattern:$0x76325410]  ;;  %v2565_v25 = vld [vmem:[%s3275_s1 + $0x118] sm:$0xff]   ;;  %v2569_v32 = vld [vmem:[%s3275_s1 + $0x128] sm:$0xff]  }
  0x2f   : > { %v344_v16 = vcombine.low %v336_v11, %v2892_v14  ;;  %v2970_v50 = vsel %vm2945_vm14, %v1977_v39, %v607_v42  ;;  %v911_v60 = vcombine.high %v2037_v58, %v2037_v58  ;;  %v955_v61 = vshrl.u32 %v2037_v58, 16  ;;  %v2069_v22 = vld.sshfl [vmem:[%s2809_s29 + $0x10] sm:$0x12 pattern:$0x76325410]  ;;  %v2573_v45 = vld [vmem:[%s3275_s1 + $0x138] sm:$0xff]  }
  0x30   : > { %2319 = vmatmul.mubr.bf16.vlgmr.msra.gmra.mrb[0].mxu1 %v455_v13  ;;  %v627_v54 = vcombine.low %v2966_v49, %v2970_v50  ;;  %v634_v57 = vrot.slane %v626_v53, %v2875_v7  ;;  %v958_v62 = vshll.u32 %v2037_v58, 16  ;;  %v2563_v0 = vld [vmem:[%s3275_s1 + $0x110] sm:$0xff]   ;;  %v1167_v33 = vcombine.low %v2961_v47, %v2966_v49  ;;  %v2576_v49 = vld [vmem:[%s3275_s1 + $0x1c0] sm:$0xff]   ;;  %v2578_v53 = vld [vmem:[%s3275_s1 + $0x1c8] sm:$0xff]  }
  0x31   : > { %2343 = vmatpush3.bf16.msra.mxu1 %v2542_v12  ;;  %2358 = vmatprep.mubr.msk.bf16.mxu1 %vm2688_vm0, %v2687_v1  ;;  %v957_v5 = vrot.slane %v955_v61, 6  ;;  %v964_v10 = vshll.u32 %v911_v60, 16  ;;  %v2572_v35 = vld [vmem:[%s3275_s1 + $0x170] sm:$0xff]   ;;  %v2575_v40 = vld [vmem:[%s3275_s1 + $0x180] sm:$0xff]  }
  0x32   : > { %2344 = vmatprep.subr.bf16.mxu1 %v2687_v1  ;;  %2299 = vmatmul.mubr.bf16.vlgmr.msra.gmra.mrb[0].mxu0 %v344_v16  ;;  %v2992_v59 = vrot.slane %v627_v54, %v2875_v7  ;;  %v960_v6 = vrot.slane %v958_v62, 7  ;;  %v2562_v16 = vld [vmem:[%s3275_s1 + $0x148] sm:$0xff]   ;;  %v2165_v36 = vld.sshfl [vmem:[%s2809_s29 + $0x14] sm:$0x12 pattern:$0x76325410]  ;;  %v1175_v38 = vrot.slane %v1167_v33, %v2875_v7 }
  0x33   : > { %2323 = vmatpush3.bf16.msra.mxu0 %v2541_v15  ;;  %2338 = vmatprep.mubr.msk.bf16.mxu0 %vm2688_vm0, %v2687_v1  ;;  %v966_v13 = vrot.slane %v964_v10, 7  ;;  %v2557_v15 = vld [vmem:[%s3275_s1 + $0x100] sm:$0xff]   ;;  %v1674_v41 = vcombine.high %v2165_v36, %v2165_v36  ;;  %v2169_v42 = vrot.slane %v2165_v36, 9  ;;  %v2580_v58 = vld [vmem:[%s3275_s1 + $0x1d0] sm:$0xff]  }
  0x34   : > { %2324 = vmatprep.subr.bf16.mxu0 %v2687_v1  ;;  %v642_v11 = vcombine.low %v634_v57, %v2992_v59  ;;  %v961_v12 = vor.u32 %v960_v6, %v957_v5  ;;  %v2133_v51 = vld.sshfl [vmem:[%s2809_s29 + $0x14] sm:$0x13 pattern:$0x76325410]  ;;  %v2577_v57 = vld [vmem:[%s3275_s1 + $0x188] sm:$0xff]   ;;  %v2581_v6 = vld [vmem:[%s3275_s1 + $0x198] sm:$0xff]  }
  0x35   : > { %2345 = vmatpush3.bf16.msra.mxu1 %v2544_v17  ;;  %v1496_v54 = vshrl.u32 %v2133_v51, 16  ;;  %v1452_v60 = vcombine.high %v2133_v51, %v2133_v51  ;;  %v2584_v10 = vld [vmem:[%s3275_s1 + $0x1e0] sm:$0xff]   ;;  %v2605_v46 = vld.sshfl [vmem:[%s2809_s29 + $0x8] sm:$0xf pattern:$0x76325410] }
  0x36   : > { %2346 = vmatprep.subr.bf16.mxu1 %v2687_v1  ;;  %v962_v17 = vrot.slane %v961_v12, 2 }
  0x37   : > { %2325 = vmatpush3.bf16.msra.mxu0 %v2543_v18  ;;  %v1498_v61 = vrot.slane %v1496_v54, 6  ;;  %v1505_v5 = vshll.u32 %v1452_v60, 16 }
  0x38   : > { %2326 = vmatprep.subr.bf16.mxu0 %v2687_v1  ;;  %v3015_v18 = vsel %vm2852_vm7, %v962_v17, %v966_v13  ;;  %v2583_v13 = vld [vmem:[%s3275_s1 + $0x1a0] sm:$0xff]   ;;  %v2585_v17 = vld [vmem:[%s3275_s1 + $0x1a8] sm:$0xff]  }
  0x39   : > { %2347 = vmatpush3.bf16.msra.mxu1 %v2546_v19  ;;  %v2561_v19 = vld [vmem:[%s3275_s1 + $0x108] sm:$0xff]   ;;  %v986_v20 = vcombine.low %v2883_v9, %v3015_v18  ;;  %v1133_v9 = vcombine.high %v2069_v22, %v2069_v22  ;;  %v1507_v12 = vrot.slane %v1505_v5, 7 }
  0x3a   : > { %2348 = vmatprep.subr.bf16.mxu1 %v2687_v1 }
  0x3b   : > { %2327 = vmatpush3.bf16.msra.mxu0 %v2545_v23  ;;  %v2564_v23 = vld [vmem:[%s3275_s1 + $0x150] sm:$0xff]   ;;  %v3037_v24 = vrot.slane %v986_v20, %v2875_v7 }
  0x3c   : > { %2328 = vmatprep.subr.bf16.mxu0 %v2687_v1  ;;  %v2588_v20 = vld [vmem:[%s3275_s1 + $0x1f0] sm:$0xff]  }
  0x3d   : > { %2349 = vmatpush3.bf16.msra.mxu1 %v2548_v27  ;;  %v1001_v4 = vcombine.low %v3028_v21, %v3037_v24  ;;  %v2073_v27 = vrot.slane %v2069_v22, 9  ;;  %v2606_v21 = vld.sshfl [vmem:[%s2809_s29 + $0x10] sm:$0xf pattern:$0x76325410]  ;;  %v2589_v24 = vld [vmem:[%s3275_s1 + $0x1b8] sm:$0xff]  }
  0x3e   : > { %2350 = vmatprep.subr.bf16.mxu1 %v2687_v1  ;;  %v2587_v22 = vld [vmem:[%s3275_s1 + $0x1b0] sm:$0xff]   ;;  %s1932_s29 = sshll.u32 %s175_s28, 4 }
  0x3f   : > { %2329 = vmatpush3.bf16.msra.mxu0 %v2547_v28  ;;  %v1148_v28 = vrot.slane %v1133_v9, 7  ;;  %v2596_v9 = vld [vmem:[%s3275_s1 + $0x218] sm:$0xff]   ;;  %s177_s5 = scalar_lea.vmem [#allocation2], %s1932_s29 }
  0x40   : > { %2330 = vmatprep.subr.bf16.mxu0 %v2687_v1  ;;  %s1844_s6 = sshll.u32 %s177_s5, 4  ;;  %s3221_s6 = int_to_ptr.vmem [resolvable:$true] %s1844_s6 }
  0x41   : > { %2351 = vmatpush3.bf16.msra.mxu1 %v2550_v29  ;;  %v2567_v29 = vld [vmem:[%s3275_s1 + $0x120] sm:$0xff]   ;;  %v1149_v31 = vsel %vm2945_vm14, %v2073_v27, %v1148_v28  ;;  %v2599_v27 = vld [vmem:[%s3275_s1 + $0x230] sm:$0xff]   ;;  %v2600_v28 = vld [vmem:[%s3275_s1 + $0x238] sm:$0xff]   ;;  %s2607_s15 = scalar_lea.vmem %s3221_s6, 256  ;;  %p2614_p1 = scmp.lt.s32.totalorder %s3221_s6, %s2612_s19 }
  0x42   : > { %2352 = vmatprep.subr.bf16.mxu1 %v2687_v1  ;;  %v1168_v34 = vcombine.low %v2970_v50, %v1149_v31  ;;  %p2608_p12 = scmp.ne.s32.totalorder %s3221_s6, %s2607_s15  ;;  %p2615_p2 = scmp.lt.s32.totalorder %s2613_s21, %s2607_s15 }
  0x43   : > { %2331 = vmatpush3.bf16.msra.mxu0 %v2549_v37  ;;  %v2571_v37 = vld [vmem:[%s3275_s1 + $0x130] sm:$0xff]  }
  0x44   : > { %2332 = vmatprep.subr.bf16.mxu0 %v2687_v1  ;;  %v1182_v39 = vrot.slane %v1168_v34, %v2875_v7  ;;  %p2609_p13 = pnand %p2608_p12, %p2753_p4  ;;  %p2616_p3 = por %p2615_p2, %p2614_p1 }
  0x45   : > { %2353 = vmatpush3.bf16.msra.mxu1 %v2552_v43  ;;  %v2574_v43 = vld [vmem:[%s3275_s1 + $0x178] sm:$0xff]  }
  0x46   : > { %2354 = vmatprep.subr.bf16.mxu1 %v2687_v1  ;;  %v1183_v47 = vcombine.low %v1175_v38, %v1182_v39  ;;  %p2610_p0 = pneg %p2609_p13 }
  0x47   : > { %2333 = vmatpush3.bf16.msra.mxu0 %v2551_v44  ;;  %v1689_v44 = vrot.slane %v1674_v41, 7 }
  0x48   : > { %2334 = vmatprep.subr.bf16.mxu0 %v2687_v1  ;;  %p2617_p5 = pnand %p2616_p3, %p2610_p0 }
  0x49   : > { %2355 = vmatpush3.bf16.msra.mxu1 %v2554_v52  ;;  %v1690_v48 = vsel %vm2945_vm14, %v2169_v42, %v1689_v44 }
  0x4a   : > { %2356 = vmatprep.subr.bf16.mxu1 %v2687_v1  ;;  %v1709_v50 = vcombine.low %v1149_v31, %v1690_v48 }
  0x4b   : > { %2335 = vmatpush3.bf16.msra.mxu0 %v2553_v55  ;;  %v1499_v55 = vshll.u32 %v2133_v51, 16 }
  0x4c   : > { %2336 = vmatprep.subr.bf16.mxu0 %v2687_v1  ;;  %v3101_v52 = vrot.slane %v1709_v50, %v2875_v7 }
  0x4d   : > { %2357 = vmatpush3.bf16.msra.mxu1 %v2556_v56  ;;  %v1501_v62 = vrot.slane %v1499_v55, 7 }
  0x4e   : > { %2382 = vmatprep.subr.bf16.mxu1 %v2687_v1  ;;  %v1724_v56 = vcombine.low %v2992_v59, %v3101_v52 }
  0x4f   : > { %2337 = vmatpush3.bf16.msra.mxu0 %v2555_v63  ;;  %v2579_v63 = vld [vmem:[%s3275_s1 + $0x190] sm:$0xff]  }
  0x50   : > { %2359 = vmatmul.mubr.bf16.vlgmr.msra.gmra.mrb[4].mxu1 %v779_v2  ;;  %2362 = vmatprep.subr.bf16.mxu0 %v2687_v1  ;;  %v2582_v2 = vld [vmem:[%s3275_s1 + $0x1d8] sm:$0xff]  }
  0x51   : > { %2383 = vmatpush3.bf16.msra.mxu1 %v2560_v3  ;;  %2398 = vmatprep.mubr.msk.bf16.mxu1 %vm2688_vm0, %v2687_v1  ;;  %v1502_v3 = vor.u32 %v1501_v62, %v1498_v61 }
  0x52   : > { %2384 = vmatprep.subr.bf16.mxu1 %v2687_v1  ;;  %2339 = vmatmul.mubr.bf16.vlgmr.msra.gmra.mrb[4].mxu0 %v642_v11 }
  0x53   : > { %2363 = vmatpush3.bf16.msra.mxu0 %v2557_v15  ;;  %2378 = vmatprep.mubr.msk.bf16.mxu0 %vm2688_vm0, %v2687_v1  ;;  %v1503_v11 = vrot.slane %v1502_v3, 2  ;;  %v2586_v15 = vld [vmem:[%s3275_s1 + $0x1e8] sm:$0xff]  }
  0x54   : > { %2364 = vmatprep.subr.bf16.mxu0 %v2687_v1 }
  0x55   : > { %2385 = vmatpush3.bf16.msra.mxu1 %v2562_v16  ;;  %v1508_v16 = vsel %vm2852_vm7, %v1503_v11, %v1507_v12 }
  0x56   : > { %2386 = vmatprep.subr.bf16.mxu1 %v2687_v1 }
  0x57   : > { %2365 = vmatpush3.bf16.msra.mxu0 %v2561_v19  ;;  %v1527_v19 = vcombine.low %v3015_v18, %v1508_v16  ;;  %v2590_v18 = vld [vmem:[%s3275_s1 + $0x1f8] sm:$0xff]  }
  0x58   : > { %2366 = vmatprep.subr.bf16.mxu0 %v2687_v1 }
  0x59   : > { %2387 = vmatpush3.bf16.msra.mxu1 %v2564_v23  ;;  %v1541_v23 = vrot.slane %v1527_v19, %v2875_v7  ;;  %v1320_v7 = vcombine.low %v2605_v46, %v2606_v21 }
  0x5a   : > { %2388 = vmatprep.subr.bf16.mxu1 %v2687_v1 }
  0x5b   : > { %2367 = vmatpush3.bf16.msra.mxu0 %v2563_v0  ;;  %v1542_v0 = vcombine.low %v2892_v14, %v1541_v23  ;;  %v2595_v14 = vld [vmem:[%s3275_s1 + $0x210] sm:$0xff]  }
  0x5c   : > { %2368 = vmatprep.subr.bf16.mxu0 %v2687_v1 }
  0x5d   : > { %2389 = vmatpush3.bf16.msra.mxu1 %v2566_v8  ;;  %v2594_v8 = vld [vmem:[%s3275_s1 + $0x208] sm:$0xff]  }
  0x5e   : > { %2390 = vmatprep.subr.bf16.mxu1 %v2687_v1 }
  0x5f   : > { %2369 = vmatpush3.bf16.msra.mxu0 %v2565_v25  ;;  %v2597_v25 = vld [vmem:[%s3275_s1 + $0x220] sm:$0xff]  }
  0x60   : > { %2370 = vmatprep.subr.bf16.mxu0 %v2687_v1 }
  0x61   : > { %2391 = vmatpush3.bf16.msra.mxu1 %v2568_v26  ;;  %v2598_v26 = vld [vmem:[%s3275_s1 + $0x228] sm:$0xff]  }
  0x62   : > { %2392 = vmatprep.subr.bf16.mxu1 %v2687_v1 }
  0x63   : > { %2371 = vmatpush3.bf16.msra.mxu0 %v2567_v29 }
  0x64   : > { %2372 = vmatprep.subr.bf16.mxu0 %v2687_v1 }
  0x65   : > { %2393 = vmatpush3.bf16.msra.mxu1 %v2570_v30 }
  0x66   : > { %2394 = vmatprep.subr.bf16.mxu1 %v2687_v1 }
  0x67   : > { %2373 = vmatpush3.bf16.msra.mxu0 %v2569_v32 }
  0x68   : > { %2374 = vmatprep.subr.bf16.mxu0 %v2687_v1 }
  0x69   : > { %2395 = vmatpush3.bf16.msra.mxu1 %v2572_v35 }
  0x6a   : > { %2396 = vmatprep.subr.bf16.mxu1 %v2687_v1 }
  0x6b   : > { %2375 = vmatpush3.bf16.msra.mxu0 %v2571_v37 }
  0x6c   : > { %2376 = vmatprep.subr.bf16.mxu0 %v2687_v1 }
  0x6d   : > { %2397 = vmatpush3.bf16.msra.mxu1 %v2574_v43 }
  0x6e   : > { %2422 = vmatprep.subr.bf16.mxu1 %v2687_v1 }
  0x6f   : > { %2377 = vmatpush3.bf16.msra.mxu0 %v2573_v45 }
  0x70   : > { %2399 = vmatmul.mubr.bf16.vlgmr.msra.gmra.mrb[8].mxu1 %v1183_v47  ;;  %2402 = vmatprep.subr.bf16.mxu0 %v2687_v1 }
  0x71   : > { %2423 = vmatpush3.bf16.msra.mxu1 %v2576_v49  ;;  %2438 = vmatprep.mubr.msk.bf16.mxu1 %vm2688_vm0, %v2687_v1 }
  0x72   : > { %2424 = vmatprep.subr.bf16.mxu1 %v2687_v1  ;;  %2379 = vmatmul.mubr.bf16.vlgmr.msra.gmra.mrb[8].mxu0 %v1001_v4  ;;  %v2593_v4 = vld [vmem:[%s3275_s1 + $0x200] sm:$0xff]  }
  0x73   : > { %2403 = vmatpush3.bf16.msra.mxu0 %v2575_v40  ;;  %2418 = vmatprep.mubr.msk.bf16.mxu0 %vm2688_vm0, %v2687_v1 }
  0x74   : > { %2404 = vmatprep.subr.bf16.mxu0 %v2687_v1 }
  0x75   : > { %2425 = vmatpush3.bf16.msra.mxu1 %v2578_v53 }
  0x76   : > { %2426 = vmatprep.subr.bf16.mxu1 %v2687_v1 }
  0x77   : > { %2405 = vmatpush3.bf16.msra.mxu0 %v2577_v57 }
  0x78   : > { %2406 = vmatprep.subr.bf16.mxu0 %v2687_v1 }
  0x79   : > { %2427 = vmatpush3.bf16.msra.mxu1 %v2580_v58 }
  0x7a   : > { %2428 = vmatprep.subr.bf16.mxu1 %v2687_v1 }
  0x7b   : > { %2407 = vmatpush3.bf16.msra.mxu0 %v2579_v63 }
  0x7c   : > { %2408 = vmatprep.subr.bf16.mxu0 %v2687_v1 }
  0x7d   : > { %2429 = vmatpush3.bf16.msra.mxu1 %v2582_v2 }
  0x7e   : > { %2430 = vmatprep.subr.bf16.mxu1 %v2687_v1 }
  0x7f   : > { %2409 = vmatpush3.bf16.msra.mxu0 %v2581_v6 }
  0x80   : > { %2410 = vmatprep.subr.bf16.mxu0 %v2687_v1 }
  0x81   : > { %2431 = vmatpush3.bf16.msra.mxu1 %v2584_v10 }
  0x82   : > { %2432 = vmatprep.subr.bf16.mxu1 %v2687_v1 }
  0x83   : > { %2411 = vmatpush3.bf16.msra.mxu0 %v2583_v13 }
  0x84   : > { %2412 = vmatprep.subr.bf16.mxu0 %v2687_v1 }
  0x85   : > { %2433 = vmatpush3.bf16.msra.mxu1 %v2586_v15 }
  0x86   : > { %2434 = vmatprep.subr.bf16.mxu1 %v2687_v1 }
  0x87   : > { %2413 = vmatpush3.bf16.msra.mxu0 %v2585_v17 }
  0x88   : > { %2414 = vmatprep.subr.bf16.mxu0 %v2687_v1 }
  0x89   : > { %2435 = vmatpush3.bf16.msra.mxu1 %v2588_v20  ;;  %v2194_v20 = vld [vmem:[%s3276_s2] ss:$0 sm:$0xff] }
  0x8a   : > { %2436 = vmatprep.subr.bf16.mxu1 %v2687_v1 }
  0x8b   : > { %2415 = vmatpush3.bf16.msra.mxu0 %v2587_v22 }
  0x8c   : > { %2416 = vmatprep.subr.bf16.mxu0 %v2687_v1 }
  0x8d   : > { %2437 = vmatpush3.bf16.msra.mxu1 %v2590_v18 }
  0x8f   : > { %2417 = vmatpush3.bf16.msra.mxu0 %v2589_v24 }
  0x90   : > { %2439 = vmatmul.mubr.bf16.vlgmr.msra.gmra.mrb[12].mxu1 %v1542_v0  ;;  %2442 = vmatprep.subr.bf16.mxu0 %v2687_v1 }
  0x92   : > { %2419 = vmatmul.mubr.bf16.vlgmr.msra.gmra.mrb[12].mxu0 %v1320_v7 }
  0x93   : > { %2443 = vmatpush3.bf16.msra.mxu0 %v2593_v4  ;;  %2458 = vmatprep.mubr.msk.bf16.mxu0 %vm2688_vm0, %v2687_v1 }
  0x94   : > { %2444 = vmatprep.subr.bf16.mxu0 %v2687_v1 }
  0x97   : > { %2445 = vmatpush3.bf16.msra.mxu0 %v2594_v8 }
  0x98   : > { %2446 = vmatprep.subr.bf16.mxu0 %v2687_v1 }
  0x9b   : > { %2447 = vmatpush3.bf16.msra.mxu0 %v2595_v14 }
  0x9c   : > { %2448 = vmatprep.subr.bf16.mxu0 %v2687_v1 }
  0x9f   : > { %2449 = vmatpush3.bf16.msra.mxu0 %v2596_v9 }
  0xa0   : > { %2450 = vmatprep.subr.bf16.mxu0 %v2687_v1 }
  0xa3   : > { %2451 = vmatpush3.bf16.msra.mxu0 %v2597_v25 }
  0xa4   : > { %2452 = vmatprep.subr.bf16.mxu0 %v2687_v1 }
  0xa7   : > { %2453 = vmatpush3.bf16.msra.mxu0 %v2598_v26 }
  0xa8   : > { %2454 = vmatprep.subr.bf16.mxu0 %v2687_v1 }
  0xab   : > { %2455 = vmatpush3.bf16.msra.mxu0 %v2599_v27 }
  0xac   : > { %2456 = vmatprep.subr.bf16.mxu0 %v2687_v1 }
  0xaf   : > { %2457 = vmatpush3.bf16.msra.mxu0 %v2600_v28 }
  0xb2   : > { %2459 = vmatmul.mubr.bf16.vlgmr.msra.gmra.mrb[16].mxu0 %v1724_v56 }
 0x103   : > { %v539_v29 = vpop.f32.mrb[0].mxu1 }
 0x104   : > { %v2320_v30 = vpop.f32.mrb[1].mxu1 }
 0x105   : > { %v542_v31 = vpop.f32.mrb[2].mxu1  ;;  %v428_v32 = vpop.f32.mrb[0].mxu0 }
 0x106   : > { %v2321_v33 = vpop.f32.mrb[3].mxu1  ;;  %v540_v34 = vadd.f32 %v539_v29, %v428_v32  ;;  %v2300_v35 = vpop.f32.mrb[1].mxu0 }
 0x107   : > { %v431_v36 = vpop.f32.mrb[2].mxu0 }
 0x108   : > { %v543_v37 = vadd.f32 %v542_v31, %v431_v36  ;;  %v2301_v38 = vpop.f32.mrb[3].mxu0 }
 0x123   : > { %v863_v39 = vpop.f32.mrb[4].mxu1 }
 0x124   : > { %v2360_v41 = vpop.f32.mrb[5].mxu1 }
 0x125   : > { %v866_v42 = vpop.f32.mrb[6].mxu1  ;;  %v726_v43 = vpop.f32.mrb[4].mxu0 }
 0x126   : > { %v2361_v1 = vpop.f32.mrb[7].mxu1  ;;  %v733_v44 = vadd.f32 %v726_v43, %v540_v34  ;;  %v2340_v45 = vpop.f32.mrb[5].mxu0 }
 0x127   : > { %v729_v47 = vpop.f32.mrb[6].mxu0 }
 0x128   : > { %v734_v59 = vadd.f32 %v729_v47, %v543_v37  ;;  %v870_v48 = vadd.f32 %v863_v39, %v733_v44  ;;  %v2341_v49 = vpop.f32.mrb[7].mxu0 }
 0x12a   : > { %v871_v50 = vadd.f32 %v866_v42, %v734_v59 }
 0x143   : > { %v1267_v51 = vpop.f32.mrb[8].mxu1 }
 0x144   : > { %v2400_v52 = vpop.f32.mrb[9].mxu1 }
 0x145   : > { %v1270_v40 = vpop.f32.mrb[10].mxu1  ;;  %v1085_v53 = vpop.f32.mrb[8].mxu0 }
 0x146   : > { %v2401_v54 = vpop.f32.mrb[11].mxu1  ;;  %v1092_v55 = vadd.f32 %v1085_v53, %v870_v48  ;;  %v2380_v56 = vpop.f32.mrb[9].mxu0 }
 0x147   : > { %v1088_v57 = vpop.f32.mrb[10].mxu0 }
 0x148   : > { %v1093_v58 = vadd.f32 %v1088_v57, %v871_v50  ;;  %v1274_v60 = vadd.f32 %v1267_v51, %v1092_v55  ;;  %v2381_v61 = vpop.f32.mrb[11].mxu0 }
 0x14a   : > { %v1275_v62 = vadd.f32 %v1270_v40, %v1093_v58 }
 0x163   : > { %v1626_v63 = vpop.f32.mrb[12].mxu1 }
 0x164   : > { %v2440_v2 = vpop.f32.mrb[13].mxu1 }
 0x165   : > { %v1629_v3 = vpop.f32.mrb[14].mxu1  ;;  %v1404_v5 = vpop.f32.mrb[12].mxu0 }
 0x166   : > { %v2441_v6 = vpop.f32.mrb[15].mxu1  ;;  %v1411_v10 = vadd.f32 %v1404_v5, %v1274_v60  ;;  %v2420_v11 = vpop.f32.mrb[13].mxu0 }
 0x167   : > { %v1407_v12 = vpop.f32.mrb[14].mxu0 }
 0x168   : > { %v1412_v13 = vadd.f32 %v1407_v12, %v1275_v62  ;;  %v1633_v15 = vadd.f32 %v1626_v63, %v1411_v10  ;;  %v2421_v16 = vpop.f32.mrb[15].mxu0 }
 0x16a   : > { %v1634_v17 = vadd.f32 %v1629_v3, %v1412_v13 }
 0x185   : > { %v1808_v19 = vpop.f32.mrb[16].mxu0 }
 0x186   : > { %v1815_v46 = vadd.f32 %v1808_v19, %v1633_v15  ;;  %v2460_v21 = vpop.f32.mrb[17].mxu0 }
 0x187   : > { %v1811_v22 = vpop.f32.mrb[18].mxu0 }
 0x188   : > { %v1824_v23 = vadd.f32 %v2194_v20, %v1815_v46  ;;  %v1816_v18 = vadd.f32 %v1811_v22, %v1634_v17  ;;  %v2461_v24 = vpop.f32.mrb[19].mxu0 }
 0x18a   : > { %1826 = vst [vmem:[%s177_s5] sm:$0xff] %v1824_v23  ;;  %v1825_v0 = vadd.f32 %v2194_v20, %v1816_v18 }
 0x18c   : > { %1827 = vst [vmem:[%s177_s5 + $0x8] sm:$0xff] %v1825_v0 }
 0x18d   : > { %2620 = shalt.err (!%p2617_p5)
}
 0x18e   : > { %s2621_s23 = scalar_lea.hbm %s3226_s10, 256  ;;  %s2625_s28 = scalar_lea.hbm %s3277_s3, 512 }
 0x18f   : > { %p2622_p6 = scmp.ne.s32.totalorder %s3226_s10, %s2621_s23  ;;  %p2626_p10 = scmp.lt.u32.totalorder %s3226_s10, %s3277_s3 }
 0x190   : > { %p2627_p11 = scmp.lt.u32.totalorder %s2625_s28, %s2621_s23  ;;  %p2629_p13 = scmp.lt.u32.totalorder %s2621_s23, %s3226_s10 }
 0x191   : > { %p2623_p7 = pnand %p2622_p6, %p2753_p4 }
 0x192   : > { %p2628_p12 = por %p2627_p11, %p2626_p10 }
 0x193   : > { %p2624_p9 = pneg %p2623_p7 }
 0x194   : > { %p2630_p0 = por %p2629_p13, %p2628_p12 }
 0x196   : > { %p2631_p1 = pnand %p2630_p0, %p2624_p9 }
 0x198   : > { %2634 = shalt.err (!%p2631_p1)
}
 0x199   : > { %s2691_s4 = smov 128   ;;  %s2692_s5 = smov 8  }
 0x19a   : > { %2463 = dma.vmem_to_hbm [thread:$0]  (%p2753_p4), %s3221_s6, 256, %s3226_s10, %s3228_s11, %s2691_s4, %s2691_s4, %s2692_s5  }
 0x19b PF: > { %p2469_p2 = scmp.ge.s32.totalorder %s2685_s17, 2  ;;  %s1859_s7 = sand.u32 1, %s2665_s12  }
 0x19c   : > { %s1860_s8 = scalar_lea.sflag [#allocation3], %s1859_s7 }
 0x19d   : > { %p2466_p3 = pnand %p2469_p2, %p2760_p8 }
 0x19f   : > { %2660 = dma.done.wait (!%p2466_p3), %s1860_s8, 256  }
 0x1a0   : > { %2662 = vsyncadd (!%p2466_p3), %s1860_s8, 4294967040  ;;  %s16_s17 = sadd.s32 1, %s2685_s17   ;;  %s3288_s12 = smov %s2669_s13 }
 0x1a1   : > { %p13_p5 = scmp.ge.s32.totalorder %s16_s17, 4   ;;  %s3289_s13 = smov %s2673_s14 }
 0x1a2   : > { %s3290_s14 = smov %s2766_s25  ;;  %s3291_s15 = smov %s2681_s16 }
 0x1a3   : > { %s3292_s16 = smov %s3294_s20  ;;  %15 = sbr.rel (!%p13_p5) target bundleno = 4 (0x4), region = 78 }
 0x1aa   :  { %1865 = vsyncpa [#allocation3], 1 }
 0x1ab   :  { %1867 = vsyncpa [#allocation3 + $0x1], 1 }

</bundles_post_ra>
